<compile_context>
chip_gen: v6e
topology: v6e:2x2x1
jax: 0.10.0
libtpu: 0.0.40
codegen_flags: <defaults>
</compile_context>

<pallas_src>
import math
import functools

import jax
import jax.numpy as jnp
from jax import lax
from jax.experimental import pallas as pl
from jax.experimental.pallas import tpu as pltpu


# --------------------------- helpers (host side) ---------------------------- #
def _pick_subchunk(L, target):
    """Largest sub-chunk <= target that divides L (prefer multiples of 8)."""
    if L <= target:
        return L
    for c in range(target, 7, -1):
        if L % c == 0 and c % 8 == 0:
            return c
    for c in range(target, 0, -1):
        if L % c == 0:
            return c
    return L


def _estimate_vmem_bytes(*, L, Lc, d_model, d_proj, d_inner, d_state, nheads):
    f32, bf16 = 4, 2
    weights = 2 * (d_model * d_proj + d_inner * d_model) * bf16      # double-buffered bf16
    io = 2 * 2 * L * d_model * f32                                   # u + out blocks
    consts = 2 * (Lc * Lc + nheads * d_inner + 3 * d_inner) * f32    # tri, expand, D, scalars
    acts = (L * (d_proj + 10 * d_inner) + 3 * Lc * Lc
            + 2 * d_state * d_inner) * f32
    return weights + io + consts + acts


def _vmem_limit_bytes(est_bytes):
    try:
        cap = int(pltpu.get_tpu_info().vmem_capacity_bytes)
    except Exception:
        cap = 128 << 20
    return int(max(32 << 20, min(2 * est_bytes + (16 << 20), (cap * 7) // 8)))


# --------------------------- fused SSD forward kernel ----------------------- #
def _make_ssd_fused_kernel(*, nheads, d_inner, d_state, seqlen, subchunk):
    L, H, N, Lc = seqlen, nheads, d_state, subchunk
    nc = L // Lc
    assert nc * Lc == L
    CLAMP = 85.0   # last-resort guard: exp(85) ~ 8e36 stays finite in f32/bf16
    bf16 = jnp.bfloat16

    def kernel(u_ref, win_ref, wout_ref, tri_ref, expand_ref,
               a_log_ref, dt_bias_ref, d_e_ref, o_ref):
        # ---- fused in_proj: ONE wide bf16 matmul, then lane slices -----------
        u = u_ref[0].astype(bf16)                                      # (L, d_model)
        xbcdt = jnp.dot(u, win_ref[...],
                        preferred_element_type=jnp.float32)            # (L, d_inner+2N+H)
        x = xbcdt[:, :d_inner]                                         # (L, d_inner)
        Bm = xbcdt[:, d_inner:d_inner + N]                             # (L, N)
        Cm = xbcdt[:, d_inner + N:d_inner + 2 * N]                     # (L, N)
        dtr = xbcdt[:, d_inner + 2 * N:]                               # (L, H)

        # ---- dt = softplus(dtr + dt_bias), a = dt * A  (tiny, f32) -----------
        z = dtr + dt_bias_ref[...]
        dt = jnp.where(z > 20.0, z, jnp.log1p(jnp.exp(z)))             # (L, H)
        a = dt * (-jnp.exp(a_log_ref[...]))                            # (L, H), a <= 0

        # ---- hoisted grid-invariant constants ---------------------------------
        tri = tri_ref[...]                                             # (Lc, Lc) causal incl.
        expand = expand_ref[...]                                       # (H, d_inner) 0/1
        d_e = d_e_ref[...]                                             # (1, d_inner)

        state = jnp.zeros((N, d_inner), jnp.float32) if nc > 1 else None
        y_chunks = []
        for ci in range(nc):                                           # static unroll
            sl = slice(ci * Lc, (ci + 1) * Lc)
            a_c, dt_c, x_c = a[sl], dt[sl], x[sl]
            B_c, C_c = Bm[sl], Cm[sl]

            # local inclusive cumsum over time: ONE (Lc,Lc)x(Lc,H) f32 matmul.
            cum = jnp.dot(tri, a_c, preferred_element_type=jnp.float32)   # (Lc, H)
            tot = cum[Lc - 1:Lc, :]                                       # (1, H)

            # rank-1 factorized intra-chunk decay around the chunk midpoint.
            # Exponents are bounded by ~Lc*max|dt*A|/2 thanks to sub-chunking;
            # the clamp is only a safety net for pathological dt.
            c_mid = 0.5 * tot
            dec_l = jnp.exp(jnp.clip(cum - c_mid, -CLAMP, CLAMP))         # (Lc, H)
            dec_r = jnp.exp(jnp.clip(c_mid - cum, -CLAMP, CLAMP)) * dt_c  # (Lc, H)
            stack = [dec_l, dec_r]
            if nc > 1:
                stack += [jnp.exp(cum),                # decay from chunk start (<= 1)
                          jnp.exp(tot - cum) * dt_c]   # decay to chunk end    (<= 1)

            # ---- ONE stacked head->lane expand matmul -------------------------
            st_e = jnp.dot(jnp.concatenate(stack, axis=0), expand,
                           preferred_element_type=jnp.float32)            # (k*Lc, d_inner)
            dec_l_e, dec_r_e = st_e[:Lc], st_e[Lc:2 * Lc]

            # ---- intra-chunk: shared causal (C_i . B_j) kernel (ngroups == 1) -
            cbt = lax.dot_general(C_c.astype(bf16), B_c.astype(bf16),
                                  (((1,), (1,)), ((), ())),
                                  preferred_element_type=jnp.float32)      # (Lc, Lc)
            cbt = (cbt * tri).astype(bf16)
            y_c = dec_l_e * jnp.dot(cbt, (dec_r_e * x_c).astype(bf16),
                                    preferred_element_type=jnp.float32)    # (Lc, d_inner)
            y_c = y_c + d_e * x_c

            if nc > 1:
                dec_out_e, dec_in_e = st_e[2 * Lc:3 * Lc], st_e[3 * Lc:]
                if ci > 0:      # contribution of the carried state
                    y_c = y_c + dec_out_e * jnp.dot(
                        C_c, state, preferred_element_type=jnp.float32)
                if ci < nc - 1:  # carry the state into the next sub-chunk
                    carry = jnp.dot(jnp.exp(tot), expand,
                                    preferred_element_type=jnp.float32)    # (1, d_inner)
                    contrib = lax.dot_general(
                        B_c, dec_in_e * x_c, (((0,), (0,)), ((), ())),
                        preferred_element_type=jnp.float32)                # (N, d_inner)
                    state = carry * state + contrib
            y_chunks.append(y_c)

        y = y_chunks[0] if nc == 1 else jnp.concatenate(y_chunks, axis=0)  # (L, d_inner)

        # ---- fused out_proj (bf16 MXU, f32 accum) ------------------------------
        o_ref[0] = jnp.dot(y.astype(bf16), wout_ref[...],
                           preferred_element_type=jnp.float32).astype(o_ref.dtype)

    return kernel


def ssd_forward(u, params, *, headdim, d_state, ngroups, chunk_size=256, subchunk=32):
    """Fused SSD forward.  `chunk_size` is accepted for interface parity; the
    kernel sub-chunks internally so results are chunk-size independent."""
    del chunk_size
    W_in, W_out, A_log, dt_bias, Dp = params
    B, L, d_model = u.shape
    nheads = A_log.shape[0]
    d_inner = nheads * headdim
    N = d_state
    d_proj = d_inner + 2 * ngroups * N + nheads
    assert ngroups == 1, "TODO(synk): head->group index map for ngroups > 1"
    assert W_in.shape == (d_proj, d_model) and W_out.shape == (d_model, d_inner)

    Lc = _pick_subchunk(L, subchunk)

    # Weight-only host prep: transpose + bf16 cast (no activation-sized glue).
    win_t = W_in.T.astype(jnp.bfloat16)       # (d_model, d_proj): [x | B | C | dt] lanes
    wout_t = W_out.T.astype(jnp.bfloat16)     # (d_inner, d_model)
    a_log_r = A_log.reshape(1, nheads).astype(jnp.float32)
    dt_bias_r = dt_bias.reshape(1, nheads).astype(jnp.float32)
    d_e = jnp.repeat(Dp.astype(jnp.float32), headdim).reshape(1, d_inner)

    # Grid-invariant constants, hoisted out of the kernel body.
    tri = jnp.tril(jnp.ones((Lc, Lc), jnp.float32))                     # causal + cumsum op
    expand = jnp.repeat(jnp.eye(nheads, dtype=jnp.float32), headdim, axis=1)  # (H, d_inner)

    kernel = _make_ssd_fused_kernel(nheads=nheads, d_inner=d_inner,
                                    d_state=N, seqlen=L, subchunk=Lc)
    est = _estimate_vmem_bytes(L=L, Lc=Lc, d_model=d_model, d_proj=d_proj,
                               d_inner=d_inner, d_state=N, nheads=nheads)
    inv2 = lambda b: (0, 0)

    return pl.pallas_call(
        kernel,
        out_shape=jax.ShapeDtypeStruct((B, L, d_model), jnp.float32),
        grid=(B,),
        in_specs=[
            pl.BlockSpec((1, L, d_model), lambda b: (b, 0, 0)),   # u (per batch row)
            pl.BlockSpec((d_model, d_proj), inv2),                # W_in^T  (bf16, resident)
            pl.BlockSpec((d_inner, d_model), inv2),               # W_out^T (bf16, resident)
            pl.BlockSpec((Lc, Lc), inv2),                         # causal / cumsum triangle
            pl.BlockSpec((nheads, d_inner), inv2),                # head -> lane expand
            pl.BlockSpec((1, nheads), inv2),                      # A_log
            pl.BlockSpec((1, nheads), inv2),                      # dt_bias
            pl.BlockSpec((1, d_inner), inv2),                     # D (pre-expanded)
        ],
        out_specs=pl.BlockSpec((1, L, d_model), lambda b: (b, 0, 0)),
        compiler_params=pltpu.CompilerParams(
            dimension_semantics=("parallel",),        # batch rows shard across TCs (v7x)
            vmem_limit_bytes=_vmem_limit_bytes(est)),
    )(u, win_t, wout_t, tri, expand, a_log_r, dt_bias_r, d_e)


# ------------------------------ JAX reference ------------------------------ #
def ssd_reference(u, params, *, headdim, d_state, ngroups):
    del ngroups
    W_in, W_out, A_log, dt_bias, Dp = params
    B, L, _ = u.shape
    nheads = A_log.shape[0]
    d_inner = nheads * headdim
    N = d_state

    xbcdt = jnp.einsum('bld,ed->ble', u, W_in)
    x = xbcdt[..., :d_inner]
    Bm = xbcdt[..., d_inner:d_inner + N]
    Cm = xbcdt[..., d_inner + N:d_inner + 2 * N]
    dtr = xbcdt[..., d_inner + 2 * N:]

    dt = jax.nn.softplus(dtr + dt_bias)            # (B, L, H)
    A = -jnp.exp(A_log)                            # (H,)
    x4 = x.reshape(B, L, nheads, headdim)

    def step(S, inp):
        xt, dtt, Bt, Ct = inp                      # (B,H,P),(B,H),(B,N),(B,N)
        dA = jnp.exp(dtt * A)
        S = S * dA[..., None, None] + \
            (dtt[..., None, None] * xt[..., None]) * Bt[:, None, None, :]
        y = jnp.einsum('bhpn,bn->bhp', S, Ct) + Dp[None, :, None] * xt
        return S, y

    S0 = jnp.zeros((B, nheads, headdim, N), jnp.float32)
    xs = (x4.transpose(1, 0, 2, 3), dt.transpose(1, 0, 2),
          Bm.transpose(1, 0, 2), Cm.transpose(1, 0, 2))
    _, ys = lax.scan(step, S0, xs)
    y = ys.transpose(1, 0, 2, 3).reshape(B, L, d_inner)
    return jnp.einsum('bld,ed->ble', y, W_out)


# ----------------------------------- main ----------------------------------- #
if __name__ == "__main__":
    # Small but lane-friendly config (d_model = d_inner = 128 keep the output
    # and projection lane dims dense); other hyperparams follow module defaults.
    d_model, d_state, expand_f, headdim, ngroups = 128, 64, 1, 32, 1
    d_inner = expand_f * d_model
    nheads = d_inner // headdim                     # 4
    chunk_size = 256
    batch, seqlen = 2, 64                           # 2 sub-chunks -> exercises state carry
    dt_min, dt_max, dt_init_floor = 0.001, 0.1, 1e-4
    d_in_proj = d_inner + 2 * ngroups * d_state + nheads

    key = jax.random.PRNGKey(0)
    k1, k2, k3, k4, k5 = jax.random.split(key, 5)

    # deterministic parameter init (mirrors the module __init__ shapes/formulas)
    W_in = (jax.random.normal(k1, (d_in_proj, d_model), jnp.float32)
            / math.sqrt(d_model))
    W_out = (jax.random.normal(k2, (d_model, d_inner), jnp.float32)
             / math.sqrt(d_inner))
    dt0 = jnp.exp(jax.random.uniform(k3, (nheads,), jnp.float32)
                  * (math.log(dt_max) - math.log(dt_min)) + math.log(dt_min))
    dt0 = jnp.clip(dt0, dt_init_floor)
    dt_bias = dt0 + jnp.log(-jnp.expm1(-dt0))
    A_log = jnp.log(jax.random.uniform(k4, (nheads,), jnp.float32,
                                       minval=1.0, maxval=16.0))
    Dp = jnp.ones((nheads,), jnp.float32)
    params = (W_in, W_out, A_log, dt_bias, Dp)

    u = jax.random.normal(k5, (batch, seqlen, d_model), jnp.float32)

    fwd = functools.partial(ssd_forward, headdim=headdim, d_state=d_state,
                            ngroups=ngroups, chunk_size=chunk_size)
    out = jax.block_until_ready(jax.jit(fwd)(u, params))

    # f32 sequential-scan reference on the SAME bf16-rounded weights/input the
    # kernel feeds its MXU passes (the kernel itself accumulates in f32).
    q = lambda t: t.astype(jnp.bfloat16).astype(jnp.float32)
    params_q = (q(W_in), q(W_out), A_log, dt_bias, Dp)
    ref = ssd_reference(q(u), params_q, headdim=headdim, d_state=d_state,
                        ngroups=ngroups)

    assert out.shape == u.shape
    max_err = float(jnp.max(jnp.abs(out - ref)))
    scale = float(jnp.maximum(1.0, jnp.max(jnp.abs(ref))))
    assert max_err < 3e-2 * scale, (max_err, scale)
    print("KERNEL_OK")
</pallas_src>

<mosaic_0001>
module attributes {stable_mosaic.version = 11 : i64} {
  func.func @kernel(%arg0: i32, %arg1: memref<1x64x128xf32, #tpu.memory_space<vmem>>, %arg2: memref<128x260xbf16, #tpu.memory_space<vmem>>, %arg3: memref<128x128xbf16, #tpu.memory_space<vmem>>, %arg4: memref<32x32xf32, #tpu.memory_space<vmem>>, %arg5: memref<4x128xf32, #tpu.memory_space<vmem>>, %arg6: memref<1x4xf32, #tpu.memory_space<vmem>>, %arg7: memref<1x4xf32, #tpu.memory_space<vmem>>, %arg8: memref<1x128xf32, #tpu.memory_space<vmem>>, %arg9: memref<1x64x128xf32, #tpu.memory_space<vmem>>) attributes {dimension_semantics = [#tpu.dimension_semantics<parallel>], iteration_bounds = array<i64: 2>, scalar_prefetch = 0 : i64, scratch_operands = 0 : i64, tpu.core_type = #tpu.core_type<tc>, window_params = [{transform_indices = @transform_0, window_bounds = array<i64: 1, 64, 128>}, {pipeline_mode = #tpu.pipeline_mode<synchronous>, transform_indices = @transform_1, window_bounds = array<i64: 128, 260>}, {pipeline_mode = #tpu.pipeline_mode<synchronous>, transform_indices = @transform_2, window_bounds = array<i64: 128, 128>}, {pipeline_mode = #tpu.pipeline_mode<synchronous>, transform_indices = @transform_3, window_bounds = array<i64: 32, 32>}, {pipeline_mode = #tpu.pipeline_mode<synchronous>, transform_indices = @transform_4, window_bounds = array<i64: 4, 128>}, {pipeline_mode = #tpu.pipeline_mode<synchronous>, transform_indices = @transform_5, window_bounds = array<i64: 1, 4>}, {pipeline_mode = #tpu.pipeline_mode<synchronous>, transform_indices = @transform_6, window_bounds = array<i64: 1, 4>}, {pipeline_mode = #tpu.pipeline_mode<synchronous>, transform_indices = @transform_7, window_bounds = array<i64: 1, 128>}, {transform_indices = @transform_8, window_bounds = array<i64: 1, 64, 128>}]} {
    %c0 = arith.constant 0 : index
    %c0_0 = arith.constant 0 : index
    %c0_1 = arith.constant 0 : index
    %0 = vector.load %arg1[%c0, %c0_0, %c0_1] : memref<1x64x128xf32, #tpu.memory_space<vmem>>, vector<1x64x128xf32>
    %1 = vector.shape_cast %0 : vector<1x64x128xf32> to vector<64x128xf32>
    %2 = arith.truncf %1 : vector<64x128xf32> to vector<64x128xbf16>
    %c0_2 = arith.constant 0 : index
    %c0_3 = arith.constant 0 : index
    %3 = vector.load %arg2[%c0_2, %c0_3] : memref<128x260xbf16, #tpu.memory_space<vmem>>, vector<128x260xbf16>
    %cst = arith.constant dense<0.000000e+00> : vector<64x260xf32>
    %4 = tpu.matmul %2, %3, %cst {dimension_numbers = #tpu.dot_dimension_numbers<[1], [0], [0], [1], [0, 0, 1, 1], [], []>} : vector<64x128xbf16>, vector<128x260xbf16>, vector<64x260xf32> -> vector<64x260xf32>
    %5 = vector.extract_strided_slice %4 {offsets = [0, 0], sizes = [64, 128], strides = [1, 1]} : vector<64x260xf32> to vector<64x128xf32>
    %6 = vector.extract_strided_slice %4 {offsets = [0, 128], sizes = [64, 64], strides = [1, 1]} : vector<64x260xf32> to vector<64x64xf32>
    %7 = vector.extract_strided_slice %4 {offsets = [0, 192], sizes = [64, 64], strides = [1, 1]} : vector<64x260xf32> to vector<64x64xf32>
    %8 = vector.extract_strided_slice %4 {offsets = [0, 256], sizes = [64, 4], strides = [1, 1]} : vector<64x260xf32> to vector<64x4xf32>
    %c0_4 = arith.constant 0 : index
    %c0_5 = arith.constant 0 : index
    %9 = vector.load %arg7[%c0_4, %c0_5] : memref<1x4xf32, #tpu.memory_space<vmem>>, vector<1x4xf32>
    %10 = vector.broadcast %9 : vector<1x4xf32> to vector<64x4xf32>
    %11 = arith.addf %8, %10 : vector<64x4xf32>
    %cst_6 = arith.constant 2.000000e+01 : f32
    %12 = vector.broadcast %cst_6 : f32 to vector<64x4xf32>
    %13 = arith.cmpf ogt, %11, %12 : vector<64x4xf32>
    %14 = math.exp %11 : vector<64x4xf32>
    %15 = math.log1p %14 : vector<64x4xf32>
    %16 = arith.select %13, %11, %15 : vector<64x4xi1>, vector<64x4xf32>
    %c0_7 = arith.constant 0 : index
    %c0_8 = arith.constant 0 : index
    %17 = vector.load %arg6[%c0_7, %c0_8] : memref<1x4xf32, #tpu.memory_space<vmem>>, vector<1x4xf32>
    %18 = math.exp %17 : vector<1x4xf32>
    %cst_9 = arith.constant 0.000000e+00 : f32
    %19 = vector.broadcast %cst_9 : f32 to vector<1x4xf32>
    %20 = arith.subf %19, %18 : vector<1x4xf32>
    %21 = vector.broadcast %20 : vector<1x4xf32> to vector<64x4xf32>
    %22 = arith.mulf %16, %21 : vector<64x4xf32>
    %c0_10 = arith.constant 0 : index
    %c0_11 = arith.constant 0 : index
    %23 = vector.load %arg4[%c0_10, %c0_11] : memref<32x32xf32, #tpu.memory_space<vmem>>, vector<32x32xf32>
    %c0_12 = arith.constant 0 : index
    %c0_13 = arith.constant 0 : index
    %24 = vector.load %arg5[%c0_12, %c0_13] : memref<4x128xf32, #tpu.memory_space<vmem>>, vector<4x128xf32>
    %c0_14 = arith.constant 0 : index
    %c0_15 = arith.constant 0 : index
    %25 = vector.load %arg8[%c0_14, %c0_15] : memref<1x128xf32, #tpu.memory_space<vmem>>, vector<1x128xf32>
    %cst_16 = arith.constant 0.000000e+00 : f32
    %26 = vector.broadcast %cst_16 : f32 to vector<64x128xf32>
    %27 = vector.extract_strided_slice %22 {offsets = [0, 0], sizes = [32, 4], strides = [1, 1]} : vector<64x4xf32> to vector<32x4xf32>
    %28 = vector.extract_strided_slice %16 {offsets = [0, 0], sizes = [32, 4], strides = [1, 1]} : vector<64x4xf32> to vector<32x4xf32>
    %29 = vector.extract_strided_slice %5 {offsets = [0, 0], sizes = [32, 128], strides = [1, 1]} : vector<64x128xf32> to vector<32x128xf32>
    %30 = vector.extract_strided_slice %6 {offsets = [0, 0], sizes = [32, 64], strides = [1, 1]} : vector<64x64xf32> to vector<32x64xf32>
    %31 = vector.extract_strided_slice %7 {offsets = [0, 0], sizes = [32, 64], strides = [1, 1]} : vector<64x64xf32> to vector<32x64xf32>
    %cst_17 = arith.constant dense<0.000000e+00> : vector<32x4xf32>
    %32 = tpu.matmul %23, %27, %cst_17 {dimension_numbers = #tpu.dot_dimension_numbers<[1], [0], [0], [1], [0, 0, 1, 1], [], []>} : vector<32x32xf32>, vector<32x4xf32>, vector<32x4xf32> -> vector<32x4xf32>
    %33 = vector.extract_strided_slice %32 {offsets = [31, 0], sizes = [1, 4], strides = [1, 1]} : vector<32x4xf32> to vector<1x4xf32>
    %cst_18 = arith.constant 5.000000e-01 : f32
    %34 = vector.broadcast %cst_18 : f32 to vector<1x4xf32>
    %35 = arith.mulf %34, %33 : vector<1x4xf32>
    %36 = vector.broadcast %35 : vector<1x4xf32> to vector<32x4xf32>
    %37 = arith.subf %32, %36 : vector<32x4xf32>
    %cst_19 = arith.constant -8.500000e+01 : f32
    %cst_20 = arith.constant 8.500000e+01 : f32
    %38 = vector.broadcast %cst_19 : f32 to vector<32x4xf32>
    %39 = arith.maximumf %38, %37 : vector<32x4xf32>
    %40 = vector.broadcast %cst_20 : f32 to vector<32x4xf32>
    %41 = arith.minimumf %40, %39 : vector<32x4xf32>
    %42 = math.exp %41 : vector<32x4xf32>
    %43 = vector.broadcast %35 : vector<1x4xf32> to vector<32x4xf32>
    %44 = arith.subf %43, %32 : vector<32x4xf32>
    %cst_21 = arith.constant -8.500000e+01 : f32
    %cst_22 = arith.constant 8.500000e+01 : f32
    %45 = vector.broadcast %cst_21 : f32 to vector<32x4xf32>
    %46 = arith.maximumf %45, %44 : vector<32x4xf32>
    %47 = vector.broadcast %cst_22 : f32 to vector<32x4xf32>
    %48 = arith.minimumf %47, %46 : vector<32x4xf32>
    %49 = math.exp %48 : vector<32x4xf32>
    %50 = arith.mulf %49, %28 : vector<32x4xf32>
    %51 = math.exp %32 : vector<32x4xf32>
    %52 = vector.broadcast %33 : vector<1x4xf32> to vector<32x4xf32>
    %53 = arith.subf %52, %32 : vector<32x4xf32>
    %54 = math.exp %53 : vector<32x4xf32>
    %55 = arith.mulf %54, %28 : vector<32x4xf32>
    %56 = tpu.concatenate %42, %50, %51, %55 in 0 : vector<32x4xf32>, vector<32x4xf32>, vector<32x4xf32>, vector<32x4xf32> -> vector<128x4xf32>
    %cst_23 = arith.constant dense<0.000000e+00> : vector<128x128xf32>
    %57 = tpu.matmul %56, %24, %cst_23 {dimension_numbers = #tpu.dot_dimension_numbers<[1], [0], [0], [1], [0, 0, 1, 1], [], []>} : vector<128x4xf32>, vector<4x128xf32>, vector<128x128xf32> -> vector<128x128xf32>
    %58 = vector.extract_strided_slice %57 {offsets = [0, 0], sizes = [32, 128], strides = [1, 1]} : vector<128x128xf32> to vector<32x128xf32>
    %59 = vector.extract_strided_slice %57 {offsets = [32, 0], sizes = [32, 128], strides = [1, 1]} : vector<128x128xf32> to vector<32x128xf32>
    %60 = arith.truncf %31 : vector<32x64xf32> to vector<32x64xbf16>
    %61 = arith.truncf %30 : vector<32x64xf32> to vector<32x64xbf16>
    %cst_24 = arith.constant dense<0.000000e+00> : vector<32x32xf32>
    %62 = tpu.matmul %60, %61, %cst_24 {dimension_numbers = #tpu.dot_dimension_numbers<[1], [1], [0], [0], [0, 0, 1, 0], [], []>} : vector<32x64xbf16>, vector<32x64xbf16>, vector<32x32xf32> -> vector<32x32xf32>
    %63 = arith.mulf %62, %23 : vector<32x32xf32>
    %64 = arith.truncf %63 : vector<32x32xf32> to vector<32x32xbf16>
    %65 = arith.mulf %59, %29 : vector<32x128xf32>
    %66 = arith.truncf %65 : vector<32x128xf32> to vector<32x128xbf16>
    %cst_25 = arith.constant dense<0.000000e+00> : vector<32x128xf32>
    %67 = tpu.matmul %64, %66, %cst_25 {dimension_numbers = #tpu.dot_dimension_numbers<[1], [0], [0], [1], [0, 0, 1, 1], [], []>} : vector<32x32xbf16>, vector<32x128xbf16>, vector<32x128xf32> -> vector<32x128xf32>
    %68 = arith.mulf %58, %67 : vector<32x128xf32>
    %69 = vector.broadcast %25 : vector<1x128xf32> to vector<32x128xf32>
    %70 = arith.mulf %69, %29 : vector<32x128xf32>
    %71 = arith.addf %68, %70 : vector<32x128xf32>
    %72 = vector.extract_strided_slice %57 {offsets = [96, 0], sizes = [32, 128], strides = [1, 1]} : vector<128x128xf32> to vector<32x128xf32>
    %73 = math.exp %33 : vector<1x4xf32>
    %cst_26 = arith.constant dense<0.000000e+00> : vector<1x128xf32>
    %74 = tpu.matmul %73, %24, %cst_26 {dimension_numbers = #tpu.dot_dimension_numbers<[1], [0], [0], [1], [0, 0, 1, 1], [], []>} : vector<1x4xf32>, vector<4x128xf32>, vector<1x128xf32> -> vector<1x128xf32>
    %75 = arith.mulf %72, %29 : vector<32x128xf32>
    %cst_27 = arith.constant dense<0.000000e+00> : vector<64x128xf32>
    %76 = tpu.matmul %30, %75, %cst_27 {dimension_numbers = #tpu.dot_dimension_numbers<[0], [0], [1], [1], [0, 1, 1, 1], [], []>} : vector<32x64xf32>, vector<32x128xf32>, vector<64x128xf32> -> vector<64x128xf32>
    %77 = vector.broadcast %74 : vector<1x128xf32> to vector<64x128xf32>
    %78 = arith.mulf %77, %26 : vector<64x128xf32>
    %79 = arith.addf %78, %76 : vector<64x128xf32>
    %80 = vector.extract_strided_slice %22 {offsets = [32, 0], sizes = [32, 4], strides = [1, 1]} : vector<64x4xf32> to vector<32x4xf32>
    %81 = vector.extract_strided_slice %16 {offsets = [32, 0], sizes = [32, 4], strides = [1, 1]} : vector<64x4xf32> to vector<32x4xf32>
    %82 = vector.extract_strided_slice %5 {offsets = [32, 0], sizes = [32, 128], strides = [1, 1]} : vector<64x128xf32> to vector<32x128xf32>
    %83 = vector.extract_strided_slice %6 {offsets = [32, 0], sizes = [32, 64], strides = [1, 1]} : vector<64x64xf32> to vector<32x64xf32>
    %84 = vector.extract_strided_slice %7 {offsets = [32, 0], sizes = [32, 64], strides = [1, 1]} : vector<64x64xf32> to vector<32x64xf32>
    %cst_28 = arith.constant dense<0.000000e+00> : vector<32x4xf32>
    %85 = tpu.matmul %23, %80, %cst_28 {dimension_numbers = #tpu.dot_dimension_numbers<[1], [0], [0], [1], [0, 0, 1, 1], [], []>} : vector<32x32xf32>, vector<32x4xf32>, vector<32x4xf32> -> vector<32x4xf32>
    %86 = vector.extract_strided_slice %85 {offsets = [31, 0], sizes = [1, 4], strides = [1, 1]} : vector<32x4xf32> to vector<1x4xf32>
    %cst_29 = arith.constant 5.000000e-01 : f32
    %87 = vector.broadcast %cst_29 : f32 to vector<1x4xf32>
    %88 = arith.mulf %87, %86 : vector<1x4xf32>
    %89 = vector.broadcast %88 : vector<1x4xf32> to vector<32x4xf32>
    %90 = arith.subf %85, %89 : vector<32x4xf32>
    %cst_30 = arith.constant -8.500000e+01 : f32
    %cst_31 = arith.constant 8.500000e+01 : f32
    %91 = vector.broadcast %cst_30 : f32 to vector<32x4xf32>
    %92 = arith.maximumf %91, %90 : vector<32x4xf32>
    %93 = vector.broadcast %cst_31 : f32 to vector<32x4xf32>
    %94 = arith.minimumf %93, %92 : vector<32x4xf32>
    %95 = math.exp %94 : vector<32x4xf32>
    %96 = vector.broadcast %88 : vector<1x4xf32> to vector<32x4xf32>
    %97 = arith.subf %96, %85 : vector<32x4xf32>
    %cst_32 = arith.constant -8.500000e+01 : f32
    %cst_33 = arith.constant 8.500000e+01 : f32
    %98 = vector.broadcast %cst_32 : f32 to vector<32x4xf32>
    %99 = arith.maximumf %98, %97 : vector<32x4xf32>
    %100 = vector.broadcast %cst_33 : f32 to vector<32x4xf32>
    %101 = arith.minimumf %100, %99 : vector<32x4xf32>
    %102 = math.exp %101 : vector<32x4xf32>
    %103 = arith.mulf %102, %81 : vector<32x4xf32>
    %104 = math.exp %85 : vector<32x4xf32>
    %105 = vector.broadcast %86 : vector<1x4xf32> to vector<32x4xf32>
    %106 = arith.subf %105, %85 : vector<32x4xf32>
    %107 = math.exp %106 : vector<32x4xf32>
    %108 = arith.mulf %107, %81 : vector<32x4xf32>
    %109 = tpu.concatenate %95, %103, %104, %108 in 0 : vector<32x4xf32>, vector<32x4xf32>, vector<32x4xf32>, vector<32x4xf32> -> vector<128x4xf32>
    %cst_34 = arith.constant dense<0.000000e+00> : vector<128x128xf32>
    %110 = tpu.matmul %109, %24, %cst_34 {dimension_numbers = #tpu.dot_dimension_numbers<[1], [0], [0], [1], [0, 0, 1, 1], [], []>} : vector<128x4xf32>, vector<4x128xf32>, vector<128x128xf32> -> vector<128x128xf32>
    %111 = vector.extract_strided_slice %110 {offsets = [0, 0], sizes = [32, 128], strides = [1, 1]} : vector<128x128xf32> to vector<32x128xf32>
    %112 = vector.extract_strided_slice %110 {offsets = [32, 0], sizes = [32, 128], strides = [1, 1]} : vector<128x128xf32> to vector<32x128xf32>
    %113 = arith.truncf %84 : vector<32x64xf32> to vector<32x64xbf16>
    %114 = arith.truncf %83 : vector<32x64xf32> to vector<32x64xbf16>
    %cst_35 = arith.constant dense<0.000000e+00> : vector<32x32xf32>
    %115 = tpu.matmul %113, %114, %cst_35 {dimension_numbers = #tpu.dot_dimension_numbers<[1], [1], [0], [0], [0, 0, 1, 0], [], []>} : vector<32x64xbf16>, vector<32x64xbf16>, vector<32x32xf32> -> vector<32x32xf32>
    %116 = arith.mulf %115, %23 : vector<32x32xf32>
    %117 = arith.truncf %116 : vector<32x32xf32> to vector<32x32xbf16>
    %118 = arith.mulf %112, %82 : vector<32x128xf32>
    %119 = arith.truncf %118 : vector<32x128xf32> to vector<32x128xbf16>
    %cst_36 = arith.constant dense<0.000000e+00> : vector<32x128xf32>
    %120 = tpu.matmul %117, %119, %cst_36 {dimension_numbers = #tpu.dot_dimension_numbers<[1], [0], [0], [1], [0, 0, 1, 1], [], []>} : vector<32x32xbf16>, vector<32x128xbf16>, vector<32x128xf32> -> vector<32x128xf32>
    %121 = arith.mulf %111, %120 : vector<32x128xf32>
    %122 = vector.broadcast %25 : vector<1x128xf32> to vector<32x128xf32>
    %123 = arith.mulf %122, %82 : vector<32x128xf32>
    %124 = arith.addf %121, %123 : vector<32x128xf32>
    %125 = vector.extract_strided_slice %110 {offsets = [64, 0], sizes = [32, 128], strides = [1, 1]} : vector<128x128xf32> to vector<32x128xf32>
    %cst_37 = arith.constant dense<0.000000e+00> : vector<32x128xf32>
    %126 = tpu.matmul %84, %79, %cst_37 {dimension_numbers = #tpu.dot_dimension_numbers<[1], [0], [0], [1], [0, 0, 1, 1], [], []>} : vector<32x64xf32>, vector<64x128xf32>, vector<32x128xf32> -> vector<32x128xf32>
    %127 = arith.mulf %125, %126 : vector<32x128xf32>
    %128 = arith.addf %124, %127 : vector<32x128xf32>
    %129 = tpu.concatenate %71, %128 in 0 : vector<32x128xf32>, vector<32x128xf32> -> vector<64x128xf32>
    %130 = arith.truncf %129 : vector<64x128xf32> to vector<64x128xbf16>
    %c0_38 = arith.constant 0 : index
    %c0_39 = arith.constant 0 : index
    %131 = vector.load %arg3[%c0_38, %c0_39] : memref<128x128xbf16, #tpu.memory_space<vmem>>, vector<128x128xbf16>
    %cst_40 = arith.constant dense<0.000000e+00> : vector<64x128xf32>
    %132 = tpu.matmul %130, %131, %cst_40 {dimension_numbers = #tpu.dot_dimension_numbers<[1], [0], [0], [1], [0, 0, 1, 1], [], []>} : vector<64x128xbf16>, vector<128x128xbf16>, vector<64x128xf32> -> vector<64x128xf32>
    %c0_41 = arith.constant 0 : index
    %c0_42 = arith.constant 0 : index
    %c0_43 = arith.constant 0 : index
    %133 = vector.load %arg9[%c0_41, %c0_42, %c0_43] : memref<1x64x128xf32, #tpu.memory_space<vmem>>, vector<1x64x128xf32>
    %134 = vector.shape_cast %133 : vector<1x64x128xf32> to vector<64x128xf32>
    %135 = vector.shape_cast %132 : vector<64x128xf32> to vector<1x64x128xf32>
    tpu.vector_store %arg9[%c0_41, %c0_42, %c0_43], %135 {strides = array<i32>} : memref<1x64x128xf32, #tpu.memory_space<vmem>>, vector<1x64x128xf32>,
    return
  }
  func.func @transform_0(%arg0: i32) -> (i32, i32, i32) {
    %c0_i32 = arith.constant 0 : i32
    %c0_i32_0 = arith.constant 0 : i32
    %c0_i32_1 = arith.constant 0 : i32
    return %arg0, %c0_i32, %c0_i32_0 : i32, i32, i32
  }
  func.func @transform_1(%arg0: i32) -> (i32, i32) {
    %c0_i32 = arith.constant 0 : i32
    %c0_i32_0 = arith.constant 0 : i32
    %c0_i32_1 = arith.constant 0 : i32
    return %c0_i32, %c0_i32_0 : i32, i32
  }
  func.func @transform_2(%arg0: i32) -> (i32, i32) {
    %c0_i32 = arith.constant 0 : i32
    %c0_i32_0 = arith.constant 0 : i32
    %c0_i32_1 = arith.constant 0 : i32
    return %c0_i32, %c0_i32_0 : i32, i32
  }
  func.func @transform_3(%arg0: i32) -> (i32, i32) {
    %c0_i32 = arith.constant 0 : i32
    %c0_i32_0 = arith.constant 0 : i32
    %c0_i32_1 = arith.constant 0 : i32
    return %c0_i32, %c0_i32_0 : i32, i32
  }
  func.func @transform_4(%arg0: i32) -> (i32, i32) {
    %c0_i32 = arith.constant 0 : i32
    %c0_i32_0 = arith.constant 0 : i32
    %c0_i32_1 = arith.constant 0 : i32
    return %c0_i32, %c0_i32_0 : i32, i32
  }
  func.func @transform_5(%arg0: i32) -> (i32, i32) {
    %c0_i32 = arith.constant 0 : i32
    %c0_i32_0 = arith.constant 0 : i32
    %c0_i32_1 = arith.constant 0 : i32
    return %c0_i32, %c0_i32_0 : i32, i32
  }
  func.func @transform_6(%arg0: i32) -> (i32, i32) {
    %c0_i32 = arith.constant 0 : i32
    %c0_i32_0 = arith.constant 0 : i32
    %c0_i32_1 = arith.constant 0 : i32
    return %c0_i32, %c0_i32_0 : i32, i32
  }
  func.func @transform_7(%arg0: i32) -> (i32, i32) {
    %c0_i32 = arith.constant 0 : i32
    %c0_i32_0 = arith.constant 0 : i32
    %c0_i32_1 = arith.constant 0 : i32
    return %c0_i32, %c0_i32_0 : i32, i32
  }
  func.func @transform_8(%arg0: i32) -> (i32, i32, i32) {
    %c0_i32 = arith.constant 0 : i32
    %c0_i32_0 = arith.constant 0 : i32
    %c0_i32_1 = arith.constant 0 : i32
    return %arg0, %c0_i32, %c0_i32_0 : i32, i32, i32
  }
}

</mosaic_0001>

<bundles_post_ra>
// kernel: ssd_forward.1
= control target key start
LH: loop header
LB: loop body
LE: loop exit
PB: predicated region body
PF: predicated region fallthrough
CT: control target
= control target key end

     0   :  { %13 = vsyncpa [#allocation3], 0  ;;  %s3804_s0 = inlined_call_operand.vmem [shape: f32[2,64,128], index: 0, kind: input, shape index: {}]   ;;  %s3805_s1 = inlined_call_operand.vmem [shape: bf16[128,260], index: 1, kind: input, shape index: {}]   ;;  %s3806_s2 = inlined_call_operand.vmem [shape: bf16[128,128], index: 2, kind: input, shape index: {}]   ;;  %s3807_s3 = inlined_call_operand.vmem [shape: f32[32,32], index: 3, kind: input, shape index: {}]   ;;  %s3808_s4 = inlined_call_operand.vmem [shape: f32[4,128], index: 4, kind: input, shape index: {}]   ;;  %s3809_s5 = inlined_call_operand.vmem [shape: f32[1,4], index: 5, kind: input, shape index: {}]   ;;  %s3810_s6 = inlined_call_operand.vmem [shape: f32[1,4], index: 6, kind: input, shape index: {}]   ;;  %s3811_s7 = inlined_call_operand.vmem [shape: f32[1,128], index: 7, kind: input, shape index: {}]   ;;  %s3812_s8 = inlined_call_operand.hbm [shape: f32[2,64,128], index: 8, kind: output, shape index: {}]  }
   0x1   :  { %15 = vsyncpa [#allocation3 + $0x1], 0  ;;  %s3115_s27 = smov 0   ;;  %s3117_s28 = smov 0  }
   0x2   :  { %s3119_s29 = smov 0   ;;  %s3121_s30 = smov 0  }
   0x3 LB: > { %s3136_s9 = sadd.s32 4294967295, %s3061_s30   ;;  %s2362_s10 = sadd.s32 4294967294, %s3061_s30   ;;  %s3061_s30 = sphi %s3121_s30, %s3826_s30   ;;  %s3057_s29 = sphi %s3119_s29, %s3825_s29   ;;  %s3053_s28 = sphi %s3117_s28, %s3824_s28   ;;  %s3049_s27 = sphi %s3115_s27, %s3823_s27  }
   0x4   : > { %s3140_s11 = sadd.s32 1, %s3061_s30   ;;  %s201_s12 = sadd.s32 1, %s3057_s29 }
   0x5   : > { %s198_s13 = ssub.s32 %s3061_s30, %s3140_s11  ;;  %p211_p0 = scmp.ne.s32.totalorder %s3057_s29, %s3053_s28 }
   0x6   : > { %p199_p1 = scmp.eq.s32.totalorder %s198_s13, 0  ;;  %p212_p2 = scmp.eq.s32.totalorder %s3136_s9, 1 }
   0x7   : > { %p217_p3 = scmp.ne.s32.totalorder %s3053_s28, %s3049_s27  ;;  %p218_p4 = scmp.eq.s32.totalorder %s2362_s10, 1 }
   0x8   : > { %s3151_s14 = scalar_select %p199_p1, %s3057_s29, %s201_s12  }
   0x9   : > { %p3153_p5 = por %p212_p2, %p211_p0  ;;  %p3157_p6 = por %p218_p4, %p217_p3 }
   0xa   : > { %p2365_p7 = scmp.ge.s32.totalorder %s3061_s30, 1  ;;  %p265_p8 = scmp.lt.s32.totalorder %s3061_s30, 3 }
   0xc   : > { %p266_p9 = pnand %p2365_p7, %p265_p8 }
   0xd   : > { %p299_p10 = scmp.lt.s32.totalorder (!%p266_p9), %s3136_s9, 1  ;;  %s3064_s25 = smov (!%p266_p9), 64  }
   0xe   : > { %269 = sbr.rel (%p266_p9) target bundleno = 1426 (0x592), region = 52  ;;  %s296_s17 = sand.u32 (!%p266_p9), 1, %s3053_s28  }
   0xf   : > { %s2366_s18 = sshll.u32 (!%p266_p9), %s296_s17, 6  ;;  %s2489_s20 = sshll.u32 (!%p266_p9), %s3136_s9, 10 }
  0x13   : > { %v2862_v0 = vld [vmem:[%s3805_s1 + $0xb0] ss:$12 sps:$4 sm:$0xff]   ;;  %v2863_v1 = vld [vmem:[%s3805_s1 + $0x98] ss:$12 sps:$4 sm:$0xff]   ;;  %v2864_v2 = vld [vmem:[%s3805_s1 + $0x80] ss:$12 sps:$4 sm:$0xff]  }
  0x14   : > { %2606 = vmatprep.subr.bf16.mxu1 %v2862_v0  ;;  %v2865_v3 = vld [vmem:[%s3805_s1 + $0x68] ss:$12 sps:$4 sm:$0xff]   ;;  %v2870_v4 = vld [vmem:[%s3805_s1 + $0xac] ss:$12 sps:$4 sm:$0xff]   ;;  %v3063_v6 = vmov 0   ;;  %s300_s13 = scalar_select %p299_p10, %s3136_s9, 1 }
  0x15   : > { %2607 = vmatpush3.bf16.msra.mxu1 %v2862_v0  ;;  %v2872_v5 = vld [vmem:[%s3805_s1 + $0xa8] ss:$12 sps:$4 sm:$0xff]   ;;  %509 = vmatprep.mubr.bf16.mxu0 %v3063_v6  ;;  %v2866_v8 = vld [vmem:[%s3805_s1 + $0x50] ss:$12 sps:$4 sm:$0xff]   ;;  %v2867_v13 = vld [vmem:[%s3805_s1 + $0x38] ss:$12 sps:$4 sm:$0xff]  }
  0x16   : > { %2608 = vmatprep.subr.bf16.mxu1 %v2863_v1  ;;  %477 = vmatprep.subr.bf16.mxu0 %v2870_v4  ;;  %v2873_v7 = vld [vmem:[%s3805_s1 + $0x94] ss:$12 sps:$4 sm:$0xff]   ;;  %v2875_v9 = vld [vmem:[%s3805_s1 + $0x90] ss:$12 sps:$4 sm:$0xff]   ;;  %s2488_s23 = sshll.u32 %s300_s13, 6  ;;  %vm758_vm0 = vcmask 261120  }
  0x17   : > { %478 = vmatpush1.bf16.msra.mxu0 %v2872_v5  ;;  %v2876_v10 = vld [vmem:[%s3805_s1 + $0x7c] ss:$12 sps:$4 sm:$0xff]   ;;  %s3199_s12 = scalar_lea.vmem %s3804_s0, %s2488_s23  ;;  %v2878_v15 = vld [vmem:[%s3805_s1 + $0x78] ss:$12 sps:$4 sm:$0xff]   ;;  %v2868_v17 = vld [vmem:[%s3805_s1 + $0x20] ss:$12 sps:$4 sm:$0xff]   ;;  %s3759_s23 = scalar_lea.hbm %s3812_s8, %s2489_s20 }
  0x18   : > { %479 = vmatprep.subr.bf16.mxu0 %v2873_v7  ;;  %v305_v11 = vld [vmem:[%s3199_s12] sm:$0xff]  ;;  %v306_v12 = vld [vmem:[%s3199_s12 + $0x8] sm:$0xff]  ;;  %v307_v23 = vld [vmem:[%s3199_s12 + $0x10] sm:$0xff]  ;;  %vm1135_vm1 = vcmask 523264   ;;  %vm982_vm10 = vcmask 1043456   ;;  %s3727_s13 = scalar_lea.vmem [#allocation2], %s2366_s18 }
  0x19   : > { %2609 = vmatpush3.bf16.msra.mxu1 %v2863_v1  ;;  %v313_v14 = vpack.c.bf16 %v306_v12, %v305_v11  ;;  %v2879_v16 = vld [vmem:[%s3805_s1 + $0x64] ss:$12 sps:$4 sm:$0xff]   ;;  %v2881_v18 = vld [vmem:[%s3805_s1 + $0x60] ss:$12 sps:$4 sm:$0xff]   ;;  %v2884_v20 = vld [vmem:[%s3805_s1 + $0x48] ss:$12 sps:$4 sm:$0xff]  }
  0x1a   : > { %2610 = vmatprep.subr.bf16.mxu1 %v2864_v2  ;;  %v2882_v19 = vld [vmem:[%s3805_s1 + $0x4c] ss:$12 sps:$4 sm:$0xff]   ;;  %v2869_v21 = vld [vmem:[%s3805_s1 + $0x8] ss:$12 sps:$4 sm:$0xff]   ;;  %v2887_v25 = vld [vmem:[%s3805_s1 + $0x30] ss:$12 sps:$4 sm:$0xff]  }
  0x1b   : > { %480 = vmatpush1.bf16.msra.mxu0 %v2875_v9  ;;  %2622 = vmatprep.mubr.bf16.mxu1 %v313_v14  ;;  %v2885_v22 = vld [vmem:[%s3805_s1 + $0x34] ss:$12 sps:$4 sm:$0xff]   ;;  %v308_v24 = vld [vmem:[%s3199_s12 + $0x18] sm:$0xff]  ;;  %v2891_v29 = vld [vmem:[%s3805_s1 + $0x4] ss:$12 sps:$4 sm:$0xff]   ;;  %s2300_s19 = sshll.u32 %s3727_s13, 4  ;;  %s3753_s19 = int_to_ptr.vmem [resolvable:$true] %s2300_s19 }
  0x1c   : > { %481 = vmatprep.subr.bf16.mxu0 %v2876_v10  ;;  %v2888_v26 = vld [vmem:[%s3805_s1 + $0x1c] ss:$12 sps:$4 sm:$0xff]   ;;  %v314_v27 = vpack.c.bf16 %v308_v24, %v307_v23  ;;  %v2890_v28 = vld [vmem:[%s3805_s1 + $0x18] ss:$12 sps:$4 sm:$0xff]   ;;  %v2893_v30 = vld [vmem:[%s3805_s1] ss:$12 sps:$4 sm:$0xff]  }
  0x1d   : > { %2611 = vmatpush3.bf16.msra.mxu1 %v2864_v2  ;;  %v309_v31 = vld [vmem:[%s3199_s12 + $0x20] sm:$0xff]  ;;  %v310_v32 = vld [vmem:[%s3199_s12 + $0x28] sm:$0xff]  ;;  %v311_v34 = vld [vmem:[%s3199_s12 + $0x30] sm:$0xff]  ;;  %s3001_s24 = scalar_lea.vmem %s3753_s19, 1024  ;;  %s3067_s9 = smov [#allocation2]  }
  0x1e   : > { %2612 = vmatprep.subr.bf16.mxu1 %v2865_v3  ;;  %v315_v33 = vpack.c.bf16 %v310_v32, %v309_v31  ;;  %v312_v35 = vld [vmem:[%s3199_s12 + $0x38] sm:$0xff]  ;;  %v3257_v37 = vld [vmem:[%s3807_s3] sm:$0xff]  ;;  %s3764_s12 = scalar_lea.sflag [#allocation3], %s296_s17  ;;  %p3002_p11 = scmp.ne.s32.totalorder %s3753_s19, %s3001_s24 }
  0x1f   : > { %482 = vmatpush1.bf16.msra.mxu0 %v2878_v15  ;;  %v316_v36 = vpack.c.bf16 %v312_v35, %v311_v34  ;;  %v3264_v38 = vld [vmem:[%s3810_s6] ss:$0 sm:$0xff] }
  0x20   : > { %483 = vmatprep.subr.bf16.mxu0 %v2879_v16  ;;  %v734_v54 = vld [vmem:[%s3809_s5] sm:$0x1]  ;;  %p3003_p12 = pnand %p3002_p11, %p3153_p5 }
  0x21   : > { %2613 = vmatpush3.bf16.msra.mxu1 %v2865_v3  ;;  %v735_v57 = vmul.f32 1.442695, %v734_v54 }
  0x22   : > { %2614 = vmatprep.subr.bf16.mxu1 %v2866_v8  ;;  %p3004_p13 = pneg %p3003_p12 }
  0x23   : > { %484 = vmatpush1.bf16.msra.mxu0 %v2881_v18 }
  0x24   : > { %485 = vmatprep.subr.bf16.mxu0 %v2882_v19 }
  0x25   : > { %2615 = vmatpush3.bf16.msra.mxu1 %v2866_v8  ;;  %v739_v8 = vlaneseq }
  0x26   : > { %2616 = vmatprep.subr.bf16.mxu1 %v2867_v13 }
  0x27   : > { %486 = vmatpush1.bf16.msra.mxu0 %v2884_v20  ;;  %v3310_v11 = vshrl.u32 %v739_v8, 7 }
  0x28   : > { %487 = vmatprep.subr.bf16.mxu0 %v2885_v22 }
  0x29   : > { %2617 = vmatpush3.bf16.msra.mxu1 %v2867_v13  ;;  %v741_v24 = vsub.s32 0, %v3310_v11 }
  0x2a   : > { %2618 = vmatprep.subr.bf16.mxu1 %v2868_v17 }
  0x2b   : > { %488 = vmatpush1.bf16.msra.mxu0 %v2887_v25 }
  0x2c   : > { %489 = vmatprep.subr.bf16.mxu0 %v2888_v26 }
  0x2d   : > { %2619 = vmatpush3.bf16.msra.mxu1 %v2868_v17 }
  0x2e   : > { %2620 = vmatprep.subr.bf16.mxu1 %v2869_v21 }
  0x2f   : > { %490 = vmatpush1.bf16.msra.mxu0 %v2890_v28 }
  0x30   : > { %491 = vmatprep.subr.bf16.mxu0 %v2891_v29 }
  0x31   : > { %2621 = vmatpush3.bf16.msra.mxu1 %v2869_v21 }
  0x33   : > { %492 = vmatpush1.bf16.msra.mxu0 %v2893_v30 }
  0x34   : > { %2623 = vmatmul.mubr.bf16.vlgmr.msra.gmra.mxu1 %v314_v27 }
  0x35   : > { %2626 = vmatprep.mubr.bf16.mxu1 %v315_v33 }
  0x36   : > { %510 = vmatmul.mubr.bf16.vlgmr.msra.gmra.mxu0 %v313_v14 }
  0x37   : > { %519 = vmatprep.mubr.bf16.mxu0 %v3063_v6 }
  0x3c   : > { %2627 = vmatmul.mubr.bf16.gmra.mxu1 %v316_v36 }
  0x3d   : > { %2638 = vmatprep.mubr.msk.f32.mxu1 %vm758_vm0, %v3257_v37 }
  0x3e   : > { %520 = vmatmul.mubr.bf16.gmra.mxu0 %v314_v27 }
  0x3f   : > { %529 = vmatprep.mubr.bf16.mxu0 %v3063_v6 }
  0x46   : > { %530 = vmatmul.mubr.bf16.gmra.mxu0 %v315_v33 }
  0x47   : > { %539 = vmatprep.mubr.bf16.mxu0 %v3063_v6 }
  0x4e   : > { %540 = vmatmul.mubr.bf16.gmra.mxu0 %v316_v36 }
  0xf4   : > { %v2624_v39 = vpop.f32.mrf.mxu1 }
  0xf5   : > { %v3267_v40 = vadd.f32 %v2624_v39, %v3264_v38 }
  0xf6   : > { %v584_v41 = vpop.f32.mrf.mxu1  ;;  %v3281_v50 = vpop.f32.mrf.mxu0 }
  0xf7   : > { %v642_v42 = vmul.f32 1.442695, %v3267_v40  ;;  %v3271_v43 = vadd.f32 %v3264_v38, %v584_v41  ;;  %vm632_vm3 = vcmp.gt.f32.partialorder %v3267_v40, 20.0 }
  0xf8   : > { %v2625_v44 = vpop.f32.mrf.mxu1  ;;  %v3284_v52 = vpop.f32.mrf.mxu0 }
  0xf9   : > { %2902 = vpow2.f32 %v642_v42  ;;  %v638_v45 = vmul.f32 1.442695, %v3271_v43  ;;  %v3275_v46 = vadd.f32 %v2625_v44, %v3264_v38  ;;  %vm630_vm9 = vcmp.gt.f32.partialorder %v3271_v43, 20.0 }
  0xfa   : > { %v587_v47 = vpop.f32.mrf.mxu1  ;;  %v3286_v53 = vpop.f32.mrf.mxu0 }
  0xfb   : > { %2904 = vpow2.f32 %v638_v45  ;;  %v644_v48 = vmul.f32 1.442695, %v3275_v46  ;;  %v3279_v49 = vadd.f32 %v3264_v38, %v587_v47  ;;  %vm633_vm4 = vcmp.gt.f32.partialorder %v3275_v46, 20.0 }
  0xfc   : > { %v3291_v55 = vpop.f32.mrf.mxu0 }
  0xfd   : > { %2906 = vpow2.f32 %v644_v48  ;;  %v640_v51 = vmul.f32 1.442695, %v3279_v49  ;;  %v1127_v56 = vpack.c.bf16 %v3291_v55, %v3284_v52  ;;  %vm631_vm8 = vcmp.gt.f32.partialorder %v3279_v49, 20.0 }
  0xfe   : > { %v3295_v58 = vpop.f32.mrf.mxu0 }
  0xff   : > { %2908 = vpow2.f32 %v640_v51  ;;  %1131 = vrot.lane.b32.xlu0 %v1127_v56, %s3064_s25  ;;  %v1143_v12 = vsel %vm1135_vm1, %v1127_v56, 0 }
 0x100   : > { %v3298_v60 = vpop.f32.mrf.mxu0  ;;  %2910 = vpow2.f32 %v735_v57 }
 0x102   : > { %v3300_v63 = vpop.f32.mrf.mxu0 }
 0x104   : > { %v3302_v2 = vpop.f32.mrf.mxu0 }
 0x105   : > { %v1128_v5 = vpack.c.bf16 %v3302_v2, %v3298_v60 }
 0x106   : > { %v2903_v59 = vpop.eup %2902 }
 0x107   : > { %v672_v61 = vadd.f32 1.0, %v2903_v59  ;;  %1133 = vrot.lane.b32.xlu0 %v1128_v5, %s3064_s25  ;;  %2813 = vmatprep.subr.msk.bf16.mxu0 %vm1135_vm1, %v1128_v5  ;;  %v1146_v7 = vsel %vm1135_vm1, %v1128_v5, 0  ;;  %v675_v9 = vmul.f32 -0.5, %v2903_v59  ;;  %v678_v18 = vand.u32 2147483647, %v2903_v59 }
 0x108   : > { %v2905_v62 = vpop.eup %2904  ;;  %2671 = vmatpush3.bf16.xpose.msra.mxu0 %v1146_v7 }
 0x109   : > { %2912 = vlog2.f32 %v672_v61  ;;  %v654_v0 = vadd.f32 1.0, %v2905_v62  ;;  %2814 = vmatprep.subr.msk.bf16.mxu0 %vm1135_vm1, %v1127_v56  ;;  %v676_v14 = vadd.f32 1.0, %v675_v9  ;;  %v657_v15 = vmul.f32 -0.5, %v2905_v62  ;;  %v3351_v61 = vld [vmem:[%s3807_s3 + $0x8] sm:$0xff] }
 0x10a   : > { %v2907_v1 = vpop.eup %2906  ;;  %vm3314_vm2 = vcmp.lt.f32.partialorder %v678_v18, 0.0004427343  ;;  %v660_v30 = vand.u32 2147483647, %v2905_v62 }
 0x10b   : > { %2914 = vlog2.f32 %v654_v0  ;;  %v681_v3 = vadd.f32 1.0, %v2907_v1  ;;  %v684_v10 = vmul.f32 -0.5, %v2907_v1  ;;  %v687_v22 = vand.u32 2147483647, %v2907_v1  ;;  %v3372_v0 = vld [vmem:[%s3807_s3 + $0x18] sm:$0xff] }
 0x10c   : > { %v2909_v4 = vpop.eup %2908  ;;  %v677_v25 = vmul.f32 %v2903_v59, %v676_v14  ;;  %v658_v26 = vadd.f32 1.0, %v657_v15  ;;  %vm661_vm6 = vcmp.lt.f32.partialorder %v660_v30, 0.0004427343 }
 0x10d   : > { %2916 = vlog2.f32 %v681_v3  ;;  %v663_v6 = vadd.f32 1.0, %v2909_v4  ;;  %v2911_v13 = vpop.eup %2910  ;;  %v666_v16 = vmul.f32 -0.5, %v2909_v4  ;;  %v685_v20 = vadd.f32 1.0, %v684_v10 }
 0x10e   : > { %v737_v23 = vsub.f32 0.0, %v2911_v13  ;;  %v669_v31 = vand.u32 2147483647, %v2909_v4  ;;  %vm688_vm5 = vcmp.lt.f32.partialorder %v687_v22, 0.0004427343  ;;  %v659_v41 = vmul.f32 %v2905_v62, %v658_v26  ;;  %v3361_v62 = vld [vmem:[%s3807_s3 + $0x10] sm:$0xff] }
 0x10f   : > { %2918 = vlog2.f32 %v663_v6  ;;  %v667_v27 = vadd.f32 1.0, %v666_v16  ;;  %v686_v35 = vmul.f32 %v2907_v1, %v685_v20  ;;  %v2628_v1 = vpop.f32.mrf.mxu1 }
 0x110   : > { %2673 = vmatpush3.bf16.xpose.msra.mxu0 %v1143_v12  ;;  %v3324_v39 = vrot.slane %v737_v23, %v741_v24  ;;  %vm670_vm7 = vcmp.lt.f32.partialorder %v669_v31, 0.0004427343  ;;  %v3413_v29 = vadd.f32 %v2628_v1, %v3264_v38 }
 0x111   : > { %v668_v45 = vmul.f32 %v2909_v4, %v667_v27  ;;  %v600_v3 = vpop.f32.mrf.mxu1 }
 0x112   : > { %v650_v31 = vmul.f32 1.442695, %v3413_v29  ;;  %vm636_vm14 = vcmp.gt.f32.partialorder %v3413_v29, 20.0 }
 0x113   : > { %v2629_v4 = vpop.f32.mrf.mxu1 }
 0x114   : > { %v629_v5 = vadd.f32 %v2629_v4, %v3264_v38 }
 0x116   : > { %v2913_v17 = vpop.eup %2912  ;;  %v652_v6 = vmul.f32 1.442695, %v629_v5  ;;  %vm637_vm12 = vcmp.gt.f32.partialorder %v629_v5, 20.0 }
 0x117   : > { %v674_v19 = vmul.f32 0.6931472, %v2913_v17  ;;  %v3392_v17 = vpop.f32.mrf.mxu0 }
 0x118   : > { %v2915_v21 = vpop.eup %2914  ;;  %2920 = vpow2.f32 %v652_v6 }
 0x119   : > { %v680_v32 = vsel %vm3314_vm2, %v677_v25, %v674_v19  ;;  %v656_v33 = vmul.f32 0.6931472, %v2915_v21  ;;  %v533_v18 = vpop.f32.mrf.mxu0 }
 0x11a   : > { %v2917_v28 = vpop.eup %2916  ;;  %v3327_v47 = vsel %vm632_vm3, %v3267_v40, %v680_v32  ;;  %v3420_v32 = vadd.f32 %v3264_v38, %v600_v3 }
 0x11b   : > { %v683_v34 = vmul.f32 0.6931472, %v2917_v28  ;;  %v662_v51 = vsel %vm661_vm6, %v659_v41, %v656_v33  ;;  %v746_v40 = vmul.f32 %v3324_v39, %v3327_v47  ;;  %v3394_v19 = vpop.f32.mrf.mxu0  ;;  %v603_v28 = vpop.f32.mrf.mxu1  ;;  %vm3066_vm6 = vmmov 0  }
 0x11c   : > { %v2919_v36 = vpop.eup %2918  ;;  %v3416_v30 = vadd.f32 %v3264_v38, %v603_v28 }
 0x11d   : > { %v689_v42 = vsel %vm688_vm5, %v686_v35, %v683_v34  ;;  %v665_v44 = vmul.f32 0.6931472, %v2919_v36  ;;  %v537_v20 = vpop.f32.mrf.mxu0  ;;  %v646_v34 = vmul.f32 1.442695, %v3420_v32  ;;  %vm634_vm5 = vcmp.gt.f32.partialorder %v3420_v32, 20.0 }
 0x11e   : > { %v3330_v48 = vsel %vm633_vm4, %v3275_v46, %v689_v42  ;;  %v3342_v46 = vsel %vm630_vm9, %v3271_v43, %v662_v51  ;;  %v3356_v43 = vld [vmem:[%s3808_s4] sm:$0xf]  ;;  %v3396_v21 = vpack.c.bf16 %v537_v20, %v533_v18  ;;  %v648_v33 = vmul.f32 1.442695, %v3416_v30 }
 0x11f   : > { %v671_v54 = vsel %vm670_vm7, %v668_v45, %v665_v44  ;;  %v747_v56 = vmul.f32 %v3324_v39, %v3330_v48  ;;  %v3398_v22 = vpop.f32.mrf.mxu0  ;;  %vm635_vm3 = vcmp.gt.f32.partialorder %v3416_v30, 20.0  ;;  %vm933_vm4 = vcmask 31744  }
 0x120   : > { %v3336_v57 = vsel %vm631_vm8, %v3279_v49, %v671_v54  ;;  %v744_v49 = vmul.f32 %v3324_v39, %v3342_v46  ;;  %1888 = vrot.lane.b32.xlu1 %v3396_v21, %s3064_s25 }
 0x121   : > { %2630 = vmatprep.subr.mxu1 %v747_v56  ;;  %v745_v59 = vmul.f32 %v3324_v39, %v3336_v57  ;;  %v543_v23 = vpop.f32.mrf.mxu0 }
 0x122   : > { %2631 = vmatpush3.msra.mxu1 %v747_v56 }
 0x123   : > { %2632 = vmatprep.subr.mxu1 %v746_v40  ;;  %v3402_v25 = vpop.f32.mrf.mxu0 }
 0x124   : > { %2633 = vmatpush3.msra.mxu1 %v746_v40  ;;  %v3438_v40 = vsub.s32 7, %v3310_v11 }
 0x125   : > { %2634 = vmatprep.subr.mxu1 %v745_v59  ;;  %1359 = vxpose.xlu0.b32.start [1/4] (short) (narrow) %v3284_v52, 64  ;;  %v2921_v7 = vpop.eup %2920  ;;  %v547_v26 = vpop.f32.mrf.mxu0 }
 0x126   : > { %2635 = vmatpush3.msra.mxu1 %v745_v59  ;;  %v717_v8 = vadd.f32 1.0, %v2921_v7  ;;  %v720_v52 = vmul.f32 -0.5, %v2921_v7  ;;  %v723_v10 = vand.u32 2147483647, %v2921_v7  ;;  %v3404_v27 = vpack.c.bf16 %v547_v26, %v543_v23 }
 0x127   : > { %2636 = vmatprep.subr.mxu1 %v744_v49 }
 0x128   : > { %2637 = vmatpush3.msra.mxu1 %v744_v49  ;;  %2922 = vlog2.f32 %v717_v8  ;;  %v721_v9 = vadd.f32 1.0, %v720_v52  ;;  %vm724_vm11 = vcmp.lt.f32.partialorder %v723_v10, 0.0004427343  ;;  %1890 = vrot.lane.b32.xlu1 %v3404_v27, %s3064_s25 }
 0x129   : > { %2639 = vmatmul.mubr.msk.f32.vlgmr.msra.gmra.mxu1 %vm758_vm0, %v3351_v61  ;;  %2644 = vmatprep.subr.msk.mxu1 %vm982_vm10, %v3356_v43  ;;  %2924 = vpow2.f32 %v650_v31 }
 0x12a   : > { %2641 = vmatprep.mubr.msk.f32.mxu1 %vm758_vm0, %v3361_v62  ;;  %2645 = vmatpush3.msk.msra.mxu1 %vm982_vm10, %v3356_v43  ;;  %v722_v12 = vmul.f32 %v2921_v7, %v721_v9  ;;  %2926 = vpow2.f32 %v648_v33 }
 0x12b   : > { %1360 = vxpose.xlu0.b32.cont [2/4] (short) (narrow) %v3291_v55, 64  ;;  %2928 = vpow2.f32 %v646_v34 }
 0x12c   : > { %2036 = vrot.lane.b32.xlu1 %v533_v18, %s3064_s25 }
 0x12d   : > { %2642 = vmatmul.mubr.msk.f32.gmra.mxu1 %vm758_vm0, %v3372_v0 }
 0x12f   : > { %1361 = vxpose.xlu0.b32.cont [3/4] (short) (narrow) %v3298_v60, 64 }
 0x130   : > { %2038 = vrot.lane.b32.xlu1 %v537_v20, %s3064_s25 }
 0x133   : > { %1362 = vxpose.xlu0.b32.end [4/4] (short) (narrow) %v3302_v2, 64 }
 0x134   : > { %2040 = vrot.lane.b32.xlu1 %v543_v23, %s3064_s25 }
 0x135   : > { %v2923_v13 = vpop.eup %2922 }
 0x136   : > { %v719_v55 = vmul.f32 0.6931472, %v2923_v13  ;;  %v2925_v35 = vpop.eup %2924 }
 0x137   : > { %v3424_v36 = vpop.eup %2926  ;;  %v708_v41 = vadd.f32 1.0, %v2925_v35  ;;  %v714_v33 = vand.u32 2147483647, %v2925_v35 }
 0x138   : > { %v725_v60 = vsel %vm724_vm11, %v722_v12, %v719_v55  ;;  %2042 = vrot.lane.b32.xlu1 %v547_v26, %s3064_s25  ;;  %v3428_v44 = vpop.eup %2928  ;;  %v699_v45 = vadd.f32 1.0, %v3424_v36  ;;  %v702_v12 = vmul.f32 -0.5, %v3424_v36  ;;  %s3005_s25 = sshll.u32 %s3067_s9, 4  ;;  %s3006_s25 = int_to_ptr.vmem [resolvable:$false] %s3005_s25 }
 0x139   : > { %v3383_v2 = vsel %vm637_vm12, %v629_v5, %v725_v60  ;;  %2930 = vlog2.f32 %v708_v41  ;;  %v690_v38 = vadd.f32 1.0, %v3428_v44  ;;  %v711_v5 = vmul.f32 -0.5, %v2925_v35  ;;  %s3007_s26 = scalar_lea.vmem %s3006_s25, 2048  ;;  %p3008_p0 = scmp.lt.s32.totalorder %s3753_s19, %s3006_s25 }
 0x13a   : > { %v3387_v14 = vmul.f32 %v3324_v39, %v3383_v2  ;;  %2932 = vlog2.f32 %v699_v45  ;;  %v693_v26 = vmul.f32 -0.5, %v3428_v44  ;;  %v703_v34 = vadd.f32 1.0, %v702_v12  ;;  %p3009_p1 = scmp.lt.s32.totalorder %s3007_s26, %s3001_s24 }
 0x13b   : > { %2934 = vlog2.f32 %v690_v38  ;;  %v712_v60 = vadd.f32 1.0, %v711_v5  ;;  %vm3454_vm13 = vcmp.lt.f32.partialorder %v714_v33, 0.0004427343 }
 0x13c   : > { %2711 = vmatprep.subr.mxu1 %v3387_v14  ;;  %p3010_p2 = por %p3009_p1, %p3008_p0 }
 0x13e   : > { %p3011_p3 = pnand %p3010_p2, %p3004_p13 }
 0x146   : > { %v2931_v31 = vpop.eup %2930 }
 0x171   : > { %v1132_v15 = vpop.permute.xlu0 %1131 }
 0x172   : > { %2674 = vmatprep.mubr.msk.bf16.mxu0 %vm1135_vm1, %v1132_v15 }
 0x179   : > { %v1134_v16 = vpop.permute.xlu0 %1133 }
 0x17a   : > { %2675 = vmatmul.mubr.msk.bf16.vlgmr.msra.gmra.mxu0 %vm1135_vm1, %v1134_v16 }
 0x1e9   : > { %v3426_v42 = vpop.f32.mrf.mxu1 }
 0x1eb   : > { %v3431_v51 = vpop.f32.mrf.mxu1 }
 0x1ed   : > { %v3434_v54 = vpop.f32.mrf.mxu1 }
 0x1ee   : > { %v856_v56 = vmul.f32 0.5, %v3434_v54 }
 0x1ef   : > { %v3444_v4 = vpop.f32.mrf.mxu1 }
 0x1f0   : > { %v860_v59 = vrot.slane %v856_v56, %v3438_v40 }
 0x1f2   : > { %v861_v49 = vsub.f32 %v3431_v51, %v860_v59  ;;  %v862_v1 = vsub.f32 %v3426_v42, %v860_v59  ;;  %v864_v3 = vsub.f32 %v3434_v54, %v860_v59  ;;  %v863_v6 = vsub.f32 %v3444_v4, %v860_v59 }
 0x1f3   : > { %v883_v10 = vsub.f32 %v860_v59, %v3444_v4  ;;  %v884_v15 = vsub.f32 %v860_v59, %v3434_v54  ;;  %v881_v20 = vsub.f32 %v860_v59, %v3431_v51  ;;  %v882_v23 = vsub.f32 %v860_v59, %v3426_v42 }
 0x1f4   : > { %v2398_v7 = vclamps-f32 %v861_v49, 85.0  ;;  %v2399_v8 = vclamps-f32 %v862_v1, 85.0  ;;  %v2401_v52 = vclamps-f32 %v864_v3, 85.0  ;;  %v2400_v9 = vclamps-f32 %v863_v6, 85.0  ;;  %v2933_v49 = vpop.eup %2932 }
 0x1f5   : > { %v2404_v16 = vclamps-f32 %v883_v10, 85.0  ;;  %v2402_v41 = vclamps-f32 %v881_v20, 85.0  ;;  %v2403_v45 = vclamps-f32 %v882_v23, 85.0  ;;  %v2405_v38 = vclamps-f32 %v884_v15, 85.0 }
 0x1f6   : > { %v873_v13 = vmul.f32 1.442695, %v2398_v7  ;;  %v875_v55 = vmul.f32 1.442695, %v2399_v8  ;;  %v877_v18 = vmul.f32 1.442695, %v2400_v9  ;;  %v713_v1 = vmul.f32 %v2925_v35, %v712_v60  ;;  %v2935_v8 = vpop.eup %2934 }
 0x1f7   : > { %v879_v28 = vmul.f32 1.442695, %v2401_v52  ;;  %v897_v56 = vmul.f32 1.442695, %v2404_v16  ;;  %v705_v3 = vand.u32 2147483647, %v3424_v36  ;;  %v704_v10 = vmul.f32 %v3424_v36, %v703_v34 }
 0x1f8   : > { %2936 = vpow2.f32 %v873_v13  ;;  %v893_v5 = vmul.f32 1.442695, %v2402_v41  ;;  %v710_v6 = vmul.f32 0.6931472, %v2931_v31  ;;  %v694_v7 = vadd.f32 1.0, %v693_v26 }
 0x1f9   : > { %2938 = vpow2.f32 %v875_v55  ;;  %v895_v59 = vmul.f32 1.442695, %v2403_v45  ;;  %v696_v9 = vand.u32 2147483647, %v3428_v44  ;;  %v701_v12 = vmul.f32 0.6931472, %v2933_v49 }
 0x1fa   : > { %2940 = vpow2.f32 %v877_v18  ;;  %v899_v13 = vmul.f32 1.442695, %v2405_v38  ;;  %v916_v35 = vrot.slane %v3434_v54, %v3438_v40  ;;  %vm3463_vm15 = vcmp.lt.f32.partialorder %v705_v3, 0.0004427343 }
 0x1fb   : > { %2942 = vpow2.f32 %v879_v28  ;;  %v716_v60 = vsel %vm3454_vm13, %v713_v1, %v710_v6  ;;  %v692_v15 = vmul.f32 0.6931472, %v2935_v8  ;;  %v695_v16 = vmul.f32 %v3428_v44, %v694_v7 }
 0x1fc   : > { %2944 = vpow2.f32 %v897_v56  ;;  %vm3470_vm2 = vcmp.lt.f32.partialorder %v696_v9, 0.0004427343  ;;  %v707_v18 = vsel %vm3463_vm15, %v704_v10, %v701_v12  ;;  %v917_v20 = vsub.f32 %v916_v35, %v3431_v51 }
 0x1fd   : > { %2946 = vpow2.f32 %v893_v5  ;;  %v3479_v23 = vsel %vm636_vm14, %v3413_v29, %v716_v60  ;;  %v905_v26 = vmul.f32 1.442695, %v3431_v51  ;;  %v698_v28 = vsel %vm3470_vm2, %v695_v16, %v692_v15 }
 0x1fe   : > { %2948 = vpow2.f32 %v895_v59  ;;  %v3486_v33 = vsel %vm635_vm3, %v3416_v30, %v707_v18  ;;  %v907_v34 = vmul.f32 1.442695, %v3426_v42  ;;  %v918_v41 = vsub.f32 %v916_v35, %v3426_v42 }
 0x1ff   : > { %2950 = vpow2.f32 %v899_v13  ;;  %v921_v29 = vmul.f32 1.442695, %v917_v20  ;;  %v750_v51 = vmul.f32 %v3324_v39, %v3479_v23  ;;  %v3495_v45 = vsel %vm634_vm5, %v3420_v32, %v698_v28 }
 0x200   : > { %2952 = vpow2.f32 %v905_v26  ;;  %v909_v38 = vmul.f32 1.442695, %v3444_v4  ;;  %v919_v30 = vsub.f32 %v916_v35, %v3444_v4  ;;  %v749_v42 = vmul.f32 %v3324_v39, %v3486_v33 }
 0x201   : > { %2954 = vpow2.f32 %v907_v34  ;;  %v911_v1 = vmul.f32 1.442695, %v3434_v54  ;;  %v920_v32 = vsub.f32 %v916_v35, %v3434_v54  ;;  %v923_v3 = vmul.f32 1.442695, %v918_v41 }
 0x202   : > { %2956 = vpow2.f32 %v921_v29  ;;  %v925_v5 = vmul.f32 1.442695, %v919_v30 }
 0x203   : > { %2958 = vpow2.f32 %v909_v38  ;;  %v927_v54 = vmul.f32 1.442695, %v920_v32 }
 0x204   : > { %2960 = vpow2.f32 %v911_v1  ;;  %v1375_v1 = vpop.trf.xlu0 }
 0x205   : > { %v2937_v44 = vpop.eup %2936  ;;  %2962 = vpow2.f32 %v923_v3 }
 0x206   : > { %v2939_v31 = vpop.eup %2938  ;;  %2646 = vmatprep.mubr.msk.f32.mxu1 %vm933_vm4, %v2937_v44  ;;  %2964 = vpow2.f32 %v925_v5 }
 0x207   : > { %2647 = vmatmul.mubr.msk.f32.vlgmr.msra.gmra.mxu1 %vm933_vm4, %v2939_v31  ;;  %v2941_v56 = vpop.eup %2940  ;;  %2966 = vpow2.f32 %v927_v54 }
 0x208   : > { %2712 = vmatpush3.msra.mxu1 %v3387_v14  ;;  %v2943_v49 = vpop.eup %2942  ;;  %2649 = vmatprep.mubr.msk.f32.mxu1 %vm933_vm4, %v2941_v56  ;;  %v748_v14 = vmul.f32 %v3324_v39, %v3495_v45 }
 0x209   : > { %2713 = vmatprep.subr.mxu1 %v750_v51  ;;  %v2945_v4 = vpop.eup %2944 }
 0x20a   : > { %2714 = vmatpush3.msra.mxu1 %v750_v51  ;;  %v2947_v6 = vpop.eup %2946  ;;  %v903_v39 = vmul.f32 %v2945_v4, %v3327_v47  ;;  %v3551_v51 = vld [vmem:[%s3806_s2 + $0x38] sm:$0xff]  }
 0x20b   : > { %2715 = vmatprep.subr.mxu1 %v749_v42  ;;  %2650 = vmatmul.mubr.msk.f32.gmra.mxu1 %vm933_vm4, %v2943_v49  ;;  %v2949_v7 = vpop.eup %2948  ;;  %v901_v59 = vmul.f32 %v2947_v6, %v3342_v46 }
 0x20c   : > { %2716 = vmatpush3.msra.mxu1 %v749_v42  ;;  %v902_v8 = vmul.f32 %v2949_v7, %v3336_v57  ;;  %v2951_v52 = vpop.eup %2950  ;;  %v1376_v7 = vpop.trf.xlu0 }
 0x20d   : > { %2717 = vmatprep.subr.mxu1 %v748_v14  ;;  %2652 = vmatprep.mubr.msk.f32.mxu1 %vm933_vm4, %v901_v59  ;;  %v904_v9 = vmul.f32 %v2951_v52, %v3330_v48  ;;  %v2953_v10 = vpop.eup %2952 }
 0x20e   : > { %2718 = vmatpush3.msra.mxu1 %v748_v14  ;;  %v2955_v12 = vpop.eup %2954 }
 0x20f   : > { %2725 = vmatprep.subr.msk.mxu1 %vm982_vm10, %v3356_v43  ;;  %2653 = vmatmul.mubr.msk.f32.gmra.mxu1 %vm933_vm4, %v902_v8  ;;  %v2957_v13 = vpop.eup %2956 }
 0x210   : > { %2655 = vmatprep.mubr.msk.f32.mxu1 %vm933_vm4, %v903_v39  ;;  %v2959_v35 = vpop.eup %2958  ;;  %v929_v15 = vmul.f32 %v2957_v13, %v3342_v46  ;;  %v3065_v13 = vmov 0.0  }
 0x211   : > { %v3521_v55 = vpop.eup %2960 }
 0x212   : > { %v2963_v60 = vpop.eup %2962 }
 0x213   : > { %2656 = vmatmul.mubr.msk.f32.gmra.mxu1 %vm933_vm4, %v904_v9  ;;  %v2965_v16 = vpop.eup %2964  ;;  %v930_v36 = vmul.f32 %v2963_v60, %v3336_v57 }
 0x214   : > { %2658 = vmatprep.mubr.msk.f32.mxu1 %vm933_vm4, %v2953_v10  ;;  %v2967_v18 = vpop.eup %2966  ;;  %v931_v20 = vmul.f32 %v2965_v16, %v3327_v47  ;;  %v1377_v10 = vpop.trf.xlu0 }
 0x215   : > { %v932_v26 = vmul.f32 %v2967_v18, %v3330_v48 }
 0x217   : > { %2659 = vmatmul.mubr.msk.f32.gmra.mxu1 %vm933_vm4, %v2955_v12 }
 0x218   : > { %2661 = vmatprep.mubr.msk.f32.mxu1 %vm933_vm4, %v2959_v35 }
 0x21b   : > { %2662 = vmatmul.mubr.msk.f32.gmra.mxu1 %vm933_vm4, %v3521_v55 }
 0x21c   : > { %2664 = vmatprep.mubr.msk.f32.mxu1 %vm933_vm4, %v929_v15  ;;  %v1378_v15 = vpop.trf.xlu0 }
 0x21f   : > { %2665 = vmatmul.mubr.msk.f32.gmra.mxu1 %vm933_vm4, %v930_v36 }
 0x220   : > { %2667 = vmatprep.mubr.msk.f32.mxu1 %vm933_vm4, %v931_v20  ;;  %v1282_v20 = vrot.slane %v3521_v55, 7 }
 0x223   : > { %2668 = vmatmul.mubr.msk.f32.gmra.mxu1 %vm933_vm4, %v932_v26 }
 0x224   : > { %2719 = vmatprep.mubr.msk.f32.mxu1 %vm758_vm0, %v3257_v37 }
 0x227   : > { %2720 = vmatmul.mubr.msk.f32.vlgmr.msra.gmra.mxu1 %vm758_vm0, %v3351_v61 }
 0x228   : > { %2722 = vmatprep.mubr.msk.f32.mxu1 %vm758_vm0, %v3361_v62  ;;  %2726 = vmatpush3.msk.msra.mxu1 %vm982_vm10, %v3356_v43 }
 0x229   : > { %2789 = vmatprep.subr.bf16.mxu1 %v3551_v51 }
 0x22b   : > { %2723 = vmatmul.mubr.msk.f32.gmra.mxu1 %vm758_vm0, %v3372_v0 }
 0x23a   : > { %v2676_v47 = vpop.f32.mrf.mxu0 }
 0x23b   : > { %v1199_v48 = vmul.f32 %v2676_v47, %v3361_v62  ;;  %v1379_v47 = vpop.trf.xlu0 }
 0x23c   : > { %v1182_v57 = vpop.f32.mrf.mxu0 }
 0x23d   : > { %v1197_v44 = vmul.f32 %v1182_v57, %v3257_v37 }
 0x23e   : > { %v2677_v46 = vpop.f32.mrf.mxu0 }
 0x23f   : > { %v1200_v28 = vmul.f32 %v2677_v46, %v3372_v0 }
 0x240   : > { %v1185_v31 = vpop.f32.mrf.mxu0 }
 0x241   : > { %v1202_v34 = vpack.c.bf16 %v1200_v28, %v1199_v48  ;;  %v1198_v41 = vmul.f32 %v1185_v31, %v3351_v61  ;;  %v1380_v28 = vpop.trf.xlu0 }
 0x243   : > { %v1201_v29 = vpack.c.bf16 %v1198_v41, %v1197_v44 }
 0x245   : > { %2682 = vmatprep.mubr.msk.bf16.mxu0 %vm758_vm0, %v1201_v29 }
 0x2c7   : > { %v3554_v38 = vpop.f32.mrf.mxu1 }
 0x2c9   : > { %v3556_v30 = vpop.f32.mrf.mxu1 }
 0x2cb   : > { %v3558_v37 = vpop.f32.mrf.mxu1 }
 0x2cd   : > { %v3560_v56 = vpop.f32.mrf.mxu1 }
 0x2cf   : > { %v2654_v42 = vpop.f32.mrf.mxu1 }
 0x2d0   : > { %v1204_v59 = vmul.f32 %v2654_v42, %v3286_v53 }
 0x2d1   : > { %v1072_v49 = vpop.f32.mrf.mxu1 }
 0x2d2   : > { %v1203_v14 = vmul.f32 %v1072_v49, %v3281_v50 }
 0x2d3   : > { %v2657_v32 = vpop.f32.mrf.mxu1 }
 0x2d4   : > { %v1206_v4 = vmul.f32 %v2657_v32, %v3300_v63  ;;  %v1207_v52 = vpack.c.bf16 %v1204_v59, %v1203_v14  ;;  %v1902_v32 = vsel %vm1135_vm1, %v3404_v27, 0 }
 0x2d5   : > { %v1082_v3 = vpop.f32.mrf.mxu1 }
 0x2d6   : > { %v1205_v5 = vmul.f32 %v1082_v3, %v3295_v58 }
 0x2d7   : > { %v2660_v6 = vpop.f32.mrf.mxu1 }
 0x2d8   : > { %v1208_v54 = vpack.c.bf16 %v1206_v4, %v1205_v5 }
 0x2d9   : > { %v1092_v8 = vpop.f32.mrf.mxu1 }
 0x2da   : > { %2678 = vmatprep.subr.bf16.mxu0 %v1208_v54 }
 0x2db   : > { %v2663_v39 = vpop.f32.mrf.mxu1  ;;  %2679 = vmatpush3.bf16.msra.mxu0 %v1208_v54  ;;  %v1381_v54 = vpop.trf.xlu0 }
 0x2dc   : > { %2680 = vmatprep.subr.bf16.mxu0 %v1207_v52 }
 0x2dd   : > { %v1100_v9 = vpop.f32.mrf.mxu1 }
 0x2df   : > { %v2666_v12 = vpop.f32.mrf.mxu1  ;;  %2681 = vmatpush3.bf16.msra.mxu0 %v1207_v52 }
 0x2e0   : > { %2686 = vmatprep.subr.mxu0 %v3065_v13  ;;  %v1356_v48 = vmul.f32 %v2666_v12, %v3286_v53 }
 0x2e1   : > { %v1108_v35 = vpop.f32.mrf.mxu1 }
 0x2e2   : > { %2683 = vmatmul.mubr.msk.bf16.vlgmr.msra.gmra.mxu0 %vm758_vm0, %v1202_v34  ;;  %v1355_v55 = vmul.f32 %v1108_v35, %v3281_v50  ;;  %v1899_v35 = vsel %vm1135_vm1, %v3396_v21, 0 }
 0x2e3   : > { %v2669_v60 = vpop.f32.mrf.mxu1  ;;  %2687 = vmatpush3.msk.msra.mxu0 %vm982_vm10, %v3356_v43  ;;  %2688 = vmatprep.mubr.msk.f32.mxu0 %vm3066_vm6, %v3065_v13 }
 0x2e4   : > { %v1358_v16 = vmul.f32 %v2669_v60, %v3300_v63 }
 0x2e5   : > { %v1118_v36 = vpop.f32.mrf.mxu1 }
 0x2e6   : > { %2691 = vmatprep.subr.mxu0 %v1358_v16  ;;  %v1357_v57 = vmul.f32 %v1118_v36, %v3295_v58 }
 0x2e7   : > { %v3570_v18 = vpop.f32.mrf.mxu1 }
 0x2e9   : > { %v3573_v26 = vpop.f32.mrf.mxu1 }
 0x2ea   : > { %2689 = vmatmul.mubr.msk.f32.vlgmr.msra.gmra.mxu0 %vm933_vm4, %v1282_v20 }
 0x2eb   : > { %2692 = vmatpush3.msra.mxu0 %v1358_v16  ;;  %v3577_v43 = vpop.f32.mrf.mxu1  ;;  %2699 = vmatprep.mubr.msk.f32.mxu0 %vm758_vm0, %v1375_v1  ;;  %v1889_v16 = vpop.permute.xlu1 %1888 }
 0x2ec   : > { %2693 = vmatprep.subr.mxu0 %v1357_v57  ;;  %v1618_v46 = vmul.f32 0.5, %v3577_v43 }
 0x2ed   : > { %2694 = vmatpush3.msra.mxu0 %v1357_v57  ;;  %v3587_v29 = vpop.f32.mrf.mxu1 }
 0x2ee   : > { %v1622_v44 = vrot.slane %v1618_v46, %v3438_v40  ;;  %2695 = vmatprep.subr.mxu0 %v1356_v48 }
 0x2ef   : > { %2696 = vmatpush3.msra.mxu0 %v1356_v48  ;;  %v1891_v57 = vpop.permute.xlu1 %1890  ;;  %v1667_v48 = vmul.f32 1.442695, %v3573_v26 }
 0x2f0   : > { %v1623_v31 = vsub.f32 %v3573_v26, %v1622_v44  ;;  %v1624_v34 = vsub.f32 %v3570_v18, %v1622_v44  ;;  %v1626_v41 = vsub.f32 %v3577_v43, %v1622_v44  ;;  %2697 = vmatprep.subr.mxu0 %v1355_v55  ;;  %v1625_v42 = vsub.f32 %v3587_v29, %v1622_v44 }
 0x2f1   : > { %2698 = vmatpush3.msra.mxu0 %v1355_v55  ;;  %v1645_v4 = vsub.f32 %v1622_v44, %v3587_v29  ;;  %v1644_v52 = vsub.f32 %v1622_v44, %v3570_v18 }
 0x2f2   : > { %v2442_v49 = vclamps-f32 %v1623_v31, 85.0  ;;  %v2443_v1 = vclamps-f32 %v1624_v34, 85.0  ;;  %2700 = vmatmul.mubr.msk.f32.vlgmr.msra.gmra.mxu0 %vm758_vm0, %v1376_v7  ;;  %2815 = vmatprep.subr.msk.bf16.mxu0 %vm1135_vm1, %v3404_v27  ;;  %v2445_v3 = vclamps-f32 %v1626_v41, 85.0  ;;  %v2444_v14 = vclamps-f32 %v1625_v42, 85.0  ;;  %v2896_v42 = vld [vmem:[%s3806_s2 + $0x28] sm:$0xff]  }
 0x2f3   : > { %2752 = vmatpush3.bf16.xpose.msra.mxu0 %v1902_v32  ;;  %2702 = vmatprep.mubr.msk.f32.mxu0 %vm758_vm0, %v1377_v10  ;;  %v1646_v7 = vsub.f32 %v1622_v44, %v3577_v43  ;;  %v2448_v59 = vclamps-f32 %v1645_v4, 85.0  ;;  %v1643_v27 = vsub.f32 %v1622_v44, %v3573_v26  ;;  %v2447_v10 = vclamps-f32 %v1644_v52, 85.0 }
 0x2f4   : > { %v1635_v5 = vmul.f32 1.442695, %v2442_v49  ;;  %v1637_v6 = vmul.f32 1.442695, %v2443_v1  ;;  %2816 = vmatprep.subr.msk.bf16.mxu0 %vm1135_vm1, %v3396_v21  ;;  %v1639_v8 = vmul.f32 1.442695, %v2444_v14 }
 0x2f5   : > { %v1641_v39 = vmul.f32 1.442695, %v2445_v3  ;;  %v2446_v9 = vclamps-f32 %v1643_v27, 85.0  ;;  %v2449_v12 = vclamps-f32 %v1646_v7, 85.0  ;;  %v1659_v13 = vmul.f32 1.442695, %v2448_v59 }
 0x2f6   : > { %2968 = vpow2.f32 %v1635_v5  ;;  %2703 = vmatmul.mubr.msk.f32.gmra.mxu0 %vm758_vm0, %v1378_v15  ;;  %v1382_v15 = vpop.trf.xlu0  ;;  %v1657_v36 = vmul.f32 1.442695, %v2447_v10  ;;  %v1669_v44 = vmul.f32 1.442695, %v3570_v18  ;;  %v2897_v14 = vld [vmem:[%s3806_s2 + $0x20] sm:$0xff]  }
 0x2f7   : > { %2970 = vpow2.f32 %v1637_v6  ;;  %2705 = vmatprep.mubr.msk.f32.mxu0 %vm758_vm0, %v1379_v47  ;;  %v1655_v60 = vmul.f32 1.442695, %v2446_v9  ;;  %v1661_v20 = vmul.f32 1.442695, %v2449_v12  ;;  %v1678_v47 = vrot.slane %v3577_v43, %v3438_v40  ;;  %v2895_v40 = vld [vmem:[%s3806_s2 + $0x30] sm:$0xff]  }
 0x2f8   : > { %2972 = vpow2.f32 %v1639_v8 }
 0x2f9   : > { %2974 = vpow2.f32 %v1641_v39  ;;  %v1679_v21 = vsub.f32 %v1678_v47, %v3573_v26  ;;  %v1671_v26 = vmul.f32 1.442695, %v3587_v29  ;;  %v1681_v34 = vsub.f32 %v1678_v47, %v3587_v29 }
 0x2fa   : > { %2706 = vmatmul.mubr.msk.f32.gmra.mxu0 %vm758_vm0, %v1380_v28  ;;  %2976 = vpow2.f32 %v1659_v13  ;;  %v1680_v28 = vsub.f32 %v1678_v47, %v3570_v18  ;;  %v1673_v18 = vmul.f32 1.442695, %v3577_v43  ;;  %v1682_v1 = vsub.f32 %v1678_v47, %v3577_v43  ;;  %v3670_v47 = vld [vmem:[%s3811_s7] ss:$0 sm:$0xff] }
 0x2fb   : > { %2754 = vmatpush3.bf16.xpose.msra.mxu0 %v1899_v35  ;;  %2708 = vmatprep.mubr.msk.f32.mxu0 %vm758_vm0, %v1381_v54  ;;  %2978 = vpow2.f32 %v1655_v60  ;;  %v1683_v31 = vmul.f32 1.442695, %v1679_v21  ;;  %v2898_v54 = vld [vmem:[%s3806_s2 + $0x18] sm:$0xff]  }
 0x2fc   : > { %2980 = vpow2.f32 %v1657_v36  ;;  %v1685_v32 = vmul.f32 1.442695, %v1680_v28  ;;  %v1689_v43 = vmul.f32 1.442695, %v1682_v1  ;;  %v1275_v28 = vmul.f32 %v3670_v47, %v3286_v53 }
 0x2fd   : > { %2982 = vpow2.f32 %v1661_v20 }
 0x2fe   : > { %2709 = vmatmul.mubr.msk.f32.gmra.mxu0 %vm758_vm0, %v1382_v15  ;;  %2984 = vpow2.f32 %v1667_v48 }
 0x2ff   : > { %2755 = vmatprep.mubr.msk.bf16.mxu0 %vm1135_vm1, %v1889_v16  ;;  %2986 = vpow2.f32 %v1669_v44  ;;  %v1274_v44 = vmul.f32 %v3670_v47, %v3281_v50 }
 0x300   : > { %2988 = vpow2.f32 %v1683_v31 }
 0x301   : > { %2990 = vpow2.f32 %v1671_v26  ;;  %v1276_v26 = vmul.f32 %v3670_v47, %v3295_v58 }
 0x302   : > { %2756 = vmatmul.mubr.msk.bf16.vlgmr.msra.gmra.mxu0 %vm1135_vm1, %v1891_v57  ;;  %2992 = vpow2.f32 %v1673_v18 }
 0x303   : > { %v2969_v46 = vpop.eup %2968  ;;  %2994 = vpow2.f32 %v1685_v32 }
 0x304   : > { %v2971_v55 = vpop.eup %2970  ;;  %2727 = vmatprep.mubr.msk.f32.mxu1 %vm933_vm4, %v2969_v46  ;;  %v1277_v46 = vmul.f32 %v3670_v47, %v3300_v63 }
 0x305   : > { %2728 = vmatmul.mubr.msk.f32.vlgmr.msra.gmra.mxu1 %vm933_vm4, %v2971_v55  ;;  %v2973_v41 = vpop.eup %2972 }
 0x306   : > { %2790 = vmatpush3.bf16.msra.mxu1 %v3551_v51  ;;  %v2975_v49 = vpop.eup %2974  ;;  %2730 = vmatprep.mubr.msk.f32.mxu1 %vm933_vm4, %v2973_v41  ;;  %v1687_v51 = vmul.f32 1.442695, %v1681_v34 }
 0x307   : > { %2791 = vmatprep.subr.bf16.mxu1 %v2895_v40  ;;  %v2977_v29 = vpop.eup %2976 }
 0x308   : > { %v2979_v3 = vpop.eup %2978  ;;  %2996 = vpow2.f32 %v1687_v51  ;;  %v1665_v59 = vmul.f32 %v2977_v29, %v3479_v23 }
 0x309   : > { %2731 = vmatmul.mubr.msk.f32.gmra.mxu1 %vm933_vm4, %v2975_v49  ;;  %v2981_v4 = vpop.eup %2980  ;;  %v1663_v5 = vmul.f32 %v2979_v3, %v3495_v45  ;;  %2998 = vpow2.f32 %v1689_v43  ;;  %v3000_v43 = vld [vmem:[%s3807_s3] sm:$0xff] }
 0x30a   : > { %2792 = vmatpush3.bf16.msra.mxu1 %v2895_v40  ;;  %v1664_v6 = vmul.f32 %v2981_v4, %v3486_v33  ;;  %v2983_v7 = vpop.eup %2982 }
 0x30b   : > { %2793 = vmatprep.subr.bf16.mxu1 %v2896_v42  ;;  %2733 = vmatprep.mubr.msk.f32.mxu1 %vm933_vm4, %v1663_v5  ;;  %v1666_v8 = vmul.f32 %v2983_v7, %v3383_v2  ;;  %v2985_v27 = vpop.eup %2984 }
 0x30c   : > { %v2987_v52 = vpop.eup %2986 }
 0x30d   : > { %2734 = vmatmul.mubr.msk.f32.gmra.mxu1 %vm933_vm4, %v1664_v6  ;;  %v2989_v39 = vpop.eup %2988 }
 0x30e   : > { %2794 = vmatpush3.bf16.msra.mxu1 %v2896_v42  ;;  %2736 = vmatprep.mubr.msk.f32.mxu1 %vm933_vm4, %v1665_v59  ;;  %v2991_v9 = vpop.eup %2990  ;;  %v1691_v13 = vmul.f32 %v2989_v39, %v3495_v45  ;;  %v2899_v45 = vld [vmem:[%s3806_s2 + $0x10] sm:$0xff]  }
 0x30f   : > { %2795 = vmatprep.subr.bf16.mxu1 %v2897_v14  ;;  %v2993_v10 = vpop.eup %2992 }
 0x310   : > { %v2995_v12 = vpop.eup %2994 }
 0x311   : > { %2737 = vmatmul.mubr.msk.f32.gmra.mxu1 %vm933_vm4, %v1666_v8  ;;  %v1692_v60 = vmul.f32 %v2995_v12, %v3486_v33  ;;  %v2900_v33 = vld [vmem:[%s3806_s2 + $0x8] sm:$0xff]  }
 0x312   : > { %2796 = vmatpush3.bf16.msra.mxu1 %v2897_v14  ;;  %2739 = vmatprep.mubr.msk.f32.mxu1 %vm933_vm4, %v2985_v27 }
 0x313   : > { %2797 = vmatprep.subr.bf16.mxu1 %v2898_v54 }
 0x315   : > { %2740 = vmatmul.mubr.msk.f32.gmra.mxu1 %vm933_vm4, %v2987_v52  ;;  %v2997_v35 = vpop.eup %2996 }
 0x316   : > { %2798 = vmatpush3.bf16.msra.mxu1 %v2898_v54  ;;  %2742 = vmatprep.mubr.msk.f32.mxu1 %vm933_vm4, %v2991_v9  ;;  %v2999_v15 = vpop.eup %2998  ;;  %v1693_v16 = vmul.f32 %v2997_v35, %v3479_v23  ;;  %v2901_v23 = vld [vmem:[%s3806_s2] sm:$0xff]  }
 0x317   : > { %v1694_v36 = vmul.f32 %v2999_v15, %v3383_v2  ;;  %2799 = vmatprep.subr.bf16.mxu1 %v2899_v45 }
 0x319   : > { %2743 = vmatmul.mubr.msk.f32.gmra.mxu1 %vm933_vm4, %v2993_v10 }
 0x31a   : > { %2745 = vmatprep.mubr.msk.f32.mxu1 %vm933_vm4, %v1691_v13  ;;  %2800 = vmatpush3.bf16.msra.mxu1 %v2899_v45 }
 0x31b   : > { %2801 = vmatprep.subr.bf16.mxu1 %v2900_v33 }
 0x31d   : > { %2746 = vmatmul.mubr.msk.f32.gmra.mxu1 %vm933_vm4, %v1692_v60 }
 0x31e   : > { %2748 = vmatprep.mubr.msk.f32.mxu1 %vm933_vm4, %v1693_v16  ;;  %2802 = vmatpush3.bf16.msra.mxu1 %v2900_v33 }
 0x31f   : > { %2803 = vmatprep.subr.bf16.mxu1 %v2901_v23 }
 0x321   : > { %2749 = vmatmul.mubr.msk.f32.gmra.mxu1 %vm933_vm4, %v1694_v36 }
 0x322   : > { %2804 = vmatpush3.bf16.msra.mxu1 %v2901_v23 }
 0x3a2   : > { %v2684_v2 = vpop.f32.mrf.mxu0 }
 0x3a3   : > { %v1266_v40 = vmul.f32 %v2684_v2, %v3560_v56 }
 0x3a4   : > { %v1249_v20 = vpop.f32.mrf.mxu0 }
 0x3a5   : > { %v1264_v57 = vmul.f32 %v1249_v20, %v3556_v30  ;;  %v1280_v42 = vadd.f32 %v1276_v26, %v1266_v40 }
 0x3a6   : > { %v2685_v21 = vpop.f32.mrf.mxu0 }
 0x3a7   : > { %v1267_v48 = vmul.f32 %v2685_v21, %v3558_v37  ;;  %v1278_v37 = vadd.f32 %v1274_v44, %v1264_v57 }
 0x3a8   : > { %v1252_v55 = vpop.f32.mrf.mxu0 }
 0x3a9   : > { %v1265_v31 = vmul.f32 %v3554_v38, %v1252_v55  ;;  %v1281_v30 = vadd.f32 %v1277_v46, %v1267_v48  ;;  %v2037_v46 = vpop.permute.xlu1 %2036 }
 0x3aa   : > { %v1351_v34 = vpop.f32.mrf.mxu0 }
 0x3ab   : > { %v1279_v41 = vadd.f32 %v1275_v28, %v1265_v31  ;;  %v2146_v56 = vpack.c.bf16 %v1281_v30, %v1280_v42 }
 0x3ac   : > { %v2690_v63 = vpop.f32.mrf.mxu0 }
 0x3ad   : > { %v2145_v49 = vpack.c.bf16 %v1279_v41, %v1278_v37  ;;  %v2039_v31 = vpop.permute.xlu1 %2038 }
 0x3af   : > { %2805 = vmatprep.mubr.bf16.mxu1 %v2145_v49 }
 0x3b0   : > { %2806 = vmatmul.mubr.bf16.vlgmr.msra.gmra.mxu1 %v2146_v56 }
 0x3b1   : > { %v2041_v37 = vpop.permute.xlu1 %2040 }
 0x3b2   : > { %v3684_v18 = vpop.f32.mrf.mxu0 }
 0x3b4   : > { %v3686_v50 = vpop.f32.mrf.mxu0 }
 0x3b5   : > { %v2043_v41 = vpop.permute.xlu1 %2042 }
 0x3b6   : > { %v2704_v53 = vpop.f32.mrf.mxu0 }
 0x3b8   : > { %v1491_v1 = vpop.f32.mrf.mxu0 }
 0x3ba   : > { %v2707_v38 = vpop.f32.mrf.mxu0 }
 0x3bc   : > { %v1501_v32 = vpop.f32.mrf.mxu0 }
 0x3be   : > { %v2710_v29 = vpop.f32.mrf.mxu0 }
 0x3c0   : > { %v1511_v58 = vpop.f32.mrf.mxu0 }
 0x3c2   : > { %v2757_v51 = vpop.f32.mrf.mxu0 }
 0x3c3   : > { %v1955_v2 = vmul.f32 %v2757_v51, %v3361_v62  ;;  %v2025_v51 = vmul.f32 %v3670_v47, %v3394_v19 }
 0x3c4   : > { %v1938_v3 = vpop.f32.mrf.mxu0 }
 0x3c5   : > { %v3688_v14 = vpop.f32.mrf.mxu1  ;;  %v1953_v6 = vmul.f32 %v3000_v43, %v1938_v3 }
 0x3c6   : > { %v2758_v4 = vpop.f32.mrf.mxu0 }
 0x3c7   : > { %v3690_v5 = vpop.f32.mrf.mxu1  ;;  %v1956_v20 = vmul.f32 %v2758_v4, %v3372_v0 }
 0x3c8   : > { %v1941_v7 = vpop.f32.mrf.mxu0 }
 0x3c9   : > { %v3695_v59 = vpop.f32.mrf.mxu1  ;;  %v1954_v54 = vmul.f32 %v1941_v7, %v3351_v61  ;;  %v1523_v61 = vrot.slane %v1351_v34, %v741_v24  ;;  %v1958_v57 = vpack.c.bf16 %v1956_v20, %v1955_v2 }
 0x3cb   : > { %v3698_v8 = vpop.f32.mrf.mxu1  ;;  %v1957_v27 = vpack.c.bf16 %v1954_v54, %v1953_v6  ;;  %v1524_v23 = vmul.f32 0.0, %v1523_v61 }
 0x3cd   : > { %2763 = vmatprep.mubr.msk.bf16.mxu0 %vm758_vm0, %v1957_v27  ;;  %v2735_v52 = vpop.f32.mrf.mxu1  ;;  %v1532_v11 = vadd.f32 %v2710_v29, %v1524_v23  ;;  %v1531_v40 = vadd.f32 %v1524_v23, %v1511_v58  ;;  %v1530_v62 = vadd.f32 %v2707_v38, %v1524_v23  ;;  %v1529_v44 = vadd.f32 %v1524_v23, %v1501_v32 }
 0x3ce   : > { %v1960_v15 = vmul.f32 %v2735_v52, %v3394_v19  ;;  %v1528_v28 = vadd.f32 %v2704_v53, %v1524_v23  ;;  %v1527_v26 = vadd.f32 %v1524_v23, %v1491_v1  ;;  %v1526_v30 = vadd.f32 %v3684_v18, %v1524_v23 }
 0x3cf   : > { %v1829_v39 = vpop.f32.mrf.mxu1  ;;  %v1525_v34 = vadd.f32 %v1524_v23, %v3686_v50  ;;  %v2024_v58 = vmul.f32 %v3670_v47, %v3392_v17 }
 0x3d0   : > { %v1959_v12 = vmul.f32 %v1829_v39, %v3392_v17  ;;  %v2027_v17 = vmul.f32 %v3670_v47, %v3402_v25 }
 0x3d1   : > { %v2738_v9 = vpop.f32.mrf.mxu1 }
 0x3d2   : > { %v1962_v13 = vmul.f32 %v2738_v9, %v3402_v25  ;;  %v1963_v45 = vpack.c.bf16 %v1960_v15, %v1959_v12 }
 0x3d3   : > { %v1839_v10 = vpop.f32.mrf.mxu1 }
 0x3d4   : > { %v1961_v35 = vmul.f32 %v1839_v10, %v3398_v22 }
 0x3d5   : > { %v3704_v60 = vpop.f32.mrf.mxu1 }
 0x3d6   : > { %v1964_v16 = vpack.c.bf16 %v1962_v13, %v1961_v35 }
 0x3d7   : > { %v3709_v36 = vpop.f32.mrf.mxu1 }
 0x3d8   : > { %2759 = vmatprep.subr.bf16.mxu0 %v1964_v16 }
 0x3d9   : > { %v3711_v33 = vpop.f32.mrf.mxu1  ;;  %2760 = vmatpush3.bf16.msra.mxu0 %v1964_v16 }
 0x3da   : > { %2761 = vmatprep.subr.bf16.mxu0 %v1963_v45 }
 0x3db   : > { %v3715_v21 = vpop.f32.mrf.mxu1 }
 0x3dd   : > { %v2747_v24 = vpop.f32.mrf.mxu1  ;;  %2762 = vmatpush3.bf16.msra.mxu0 %v1963_v45 }
 0x3de   : > { %2767 = vmatprep.subr.mxu0 %v1532_v11 }
 0x3df   : > { %v1869_v48 = vpop.f32.mrf.mxu1 }
 0x3e0   : > { %2764 = vmatmul.mubr.msk.bf16.vlgmr.msra.gmra.mxu0 %vm758_vm0, %v1958_v57 }
 0x3e1   : > { %v2750_v55 = vpop.f32.mrf.mxu1  ;;  %2768 = vmatpush3.msra.mxu0 %v1532_v11  ;;  %2783 = vmatprep.mubr.msk.f32.mxu0 %vm1135_vm1, %v2037_v46 }
 0x3e2   : > { %2769 = vmatprep.subr.mxu0 %v1531_v40 }
 0x3e3   : > { %v1877_v0 = vpop.f32.mrf.mxu1  ;;  %2770 = vmatpush3.msra.mxu0 %v1531_v40 }
 0x3e4   : > { %2771 = vmatprep.subr.mxu0 %v1530_v62 }
 0x3e5   : > { %2772 = vmatpush3.msra.mxu0 %v1530_v62 }
 0x3e6   : > { %2773 = vmatprep.subr.mxu0 %v1529_v44 }
 0x3e7   : > { %2774 = vmatpush3.msra.mxu0 %v1529_v44 }
 0x3e8   : > { %2775 = vmatprep.subr.mxu0 %v1528_v28 }
 0x3e9   : > { %2776 = vmatpush3.msra.mxu0 %v1528_v28 }
 0x3ea   : > { %2777 = vmatprep.subr.mxu0 %v1527_v26 }
 0x3eb   : > { %2778 = vmatpush3.msra.mxu0 %v1527_v26 }
 0x3ec   : > { %2779 = vmatprep.subr.mxu0 %v1526_v30 }
 0x3ed   : > { %2780 = vmatpush3.msra.mxu0 %v1526_v30 }
 0x3ee   : > { %2781 = vmatprep.subr.mxu0 %v1525_v34 }
 0x3ef   : > { %2782 = vmatpush3.msra.mxu0 %v1525_v34 }
 0x3f0   : > { %2784 = vmatmul.mubr.msk.f32.vlgmr.msra.gmra.mxu0 %vm1135_vm1, %v2039_v31 }
 0x3f1   : > { %2786 = vmatprep.mubr.msk.f32.mxu0 %vm1135_vm1, %v2041_v37 }
 0x3f4   : > { %2787 = vmatmul.mubr.msk.f32.gmra.mxu0 %vm1135_vm1, %v2043_v41 }
 0x470   : > { %v2807_v42 = vpop.f32.mrf.mxu1 }
 0x471   : > { %2280 = vst [vmem:[%s3727_s13 + $0x10] sm:$0xff] %v2807_v42 }
 0x472   : > { %v2247_v63 = vpop.f32.mrf.mxu1 }
 0x473   : > { %2278 = vst [vmem:[%s3727_s13] sm:$0xff] %v2247_v63 }
 0x474   : > { %v2808_v49 = vpop.f32.mrf.mxu1 }
 0x475   : > { %2281 = vst [vmem:[%s3727_s13 + $0x18] sm:$0xff] %v2808_v49 }
 0x476   : > { %v2250_v56 = vpop.f32.mrf.mxu1 }
 0x477   : > { %2279 = vst [vmem:[%s3727_s13 + $0x8] sm:$0xff] %v2250_v56 }
 0x4a0   : > { %v2765_v18 = vpop.f32.mrf.mxu0 }
 0x4a1   : > { %v2022_v4 = vmul.f32 %v2765_v18, %v3698_v8 }
 0x4a2   : > { %v2005_v50 = vpop.f32.mrf.mxu0 }
 0x4a3   : > { %v2020_v38 = vmul.f32 %v2005_v50, %v3690_v5 }
 0x4a4   : > { %v2766_v53 = vpop.f32.mrf.mxu0 }
 0x4a5   : > { %v2028_v6 = vadd.f32 %v2024_v58, %v2020_v38  ;;  %v2023_v7 = vmul.f32 %v2766_v53, %v3695_v59 }
 0x4a6   : > { %v2008_v1 = vpop.f32.mrf.mxu0 }
 0x4a7   : > { %v2021_v32 = vmul.f32 %v3688_v14, %v2008_v1  ;;  %v2026_v14 = vmul.f32 %v3670_v47, %v3398_v22  ;;  %v2031_v9 = vadd.f32 %v2027_v17, %v2023_v7 }
 0x4a9   : > { %v2029_v54 = vadd.f32 %v2025_v51, %v2021_v32  ;;  %v2030_v59 = vadd.f32 %v2026_v14, %v2022_v4 }
 0x4b0   : > { %v2785_v29 = vpop.f32.mrf.mxu0 }
 0x4b1   : > { %v2138_v3 = vmul.f32 %v2785_v29, %v3704_v60 }
 0x4b2   : > { %v2118_v43 = vpop.f32.mrf.mxu0 }
 0x4b3   : > { %v2137_v5 = vmul.f32 %v2118_v43, %v3709_v36  ;;  %v2142_v19 = vadd.f32 %v2138_v3, %v2029_v54 }
 0x4b4   : > { %v2788_v27 = vpop.f32.mrf.mxu0 }
 0x4b5   : > { %v2141_v52 = vadd.f32 %v2137_v5, %v2028_v6  ;;  %v2140_v8 = vmul.f32 %v2788_v27, %v3711_v33 }
 0x4b6   : > { %v2128_v39 = vpop.f32.mrf.mxu0 }
 0x4b7   : > { %v2139_v10 = vmul.f32 %v2128_v39, %v3715_v21  ;;  %v2147_v12 = vpack.c.bf16 %v2142_v19, %v2141_v52  ;;  %v2144_v22 = vadd.f32 %v2140_v8, %v2031_v9 }
 0x4b9   : > { %v2143_v13 = vadd.f32 %v2139_v10, %v2030_v59  ;;  %2809 = vmatprep.mubr.bf16.mxu1 %v2147_v12 }
 0x4bb   : > { %v2148_v25 = vpack.c.bf16 %v2144_v22, %v2143_v13 }
 0x4bd   : > { %2810 = vmatmul.mubr.bf16.gmra.mxu1 %v2148_v25 }
 0x57d   : > { %v2811_v47 = vpop.f32.mrf.mxu1 }
 0x57e   : > { %2284 = vst [vmem:[%s3727_s13 + $0x30] sm:$0xff] %v2811_v47 }
 0x57f   : > { %v2263_v35 = vpop.f32.mrf.mxu1 }
 0x580   : > { %2282 = vst [vmem:[%s3727_s13 + $0x20] sm:$0xff] %v2263_v35 }
 0x581   : > { %v2812_v60 = vpop.f32.mrf.mxu1 }
 0x582   : > { %2285 = vst [vmem:[%s3727_s13 + $0x38] sm:$0xff] %v2812_v60 }
 0x583   : > { %v2266_v61 = vpop.f32.mrf.mxu1 }
 0x584   : > { %2283 = vst [vmem:[%s3727_s13 + $0x28] sm:$0xff] %v2266_v61 }
 0x585   : > { %3014 = shalt.err (!%p3011_p3)
}
 0x586   : > { %s3015_s10 = scalar_lea.hbm %s3759_s23, 1024  ;;  %s3019_s13 = scalar_lea.hbm %s3812_s8, 2048 }
 0x587   : > { %p3016_p4 = scmp.ne.s32.totalorder %s3759_s23, %s3015_s10  ;;  %p3020_p9 = scmp.lt.s32.totalorder %s3759_s23, %s3812_s8 }
 0x588   : > { %p3021_p10 = scmp.lt.s32.totalorder %s3019_s13, %s3015_s10 }
 0x589   : > { %p3017_p7 = pnand %p3016_p4, %p3153_p5 }
 0x58a   : > { %p3022_p11 = por %p3021_p10, %p3020_p9 }
 0x58b   : > { %p3018_p8 = pneg %p3017_p7 }
 0x58d   : > { %p3023_p12 = pnand %p3022_p11, %p3018_p8 }
 0x58f   : > { %3026 = shalt.err (!%p3023_p12)
}
 0x590   : > { %s3068_s22 = smov 128   ;;  %s3069_s24 = smov 8  }
 0x591   : > { %2817 = dma.vmem_to_hbm [thread:$0]  (%p3153_p5), %s3753_s19, 1024, %s3759_s23, %s3764_s12, %s3068_s22, %s3068_s22, %s3069_s24  }
 0x592 PF: > { %p2823_p13 = scmp.ge.s32.totalorder %s3061_s30, 2  ;;  %s2315_s9 = sand.u32 1, %s3049_s27  }
 0x593   : > { %s2316_s25 = scalar_lea.sflag [#allocation3], %s2315_s9 }
 0x594   : > { %p2820_p0 = pnand %p2823_p13, %p3157_p6 }
 0x596   : > { %p2821_p1 = pneg %p2820_p0 }
 0x598   : > { %3044 = dma.done.wait (%p2821_p1), %s2316_s25, 1024  }
 0x599   : > { %3046 = vsyncadd (%p2821_p1), %s2316_s25, 4294966272  ;;  %p18_p2 = scmp.ge.s32.totalorder %s3140_s11, 4   ;;  %s3823_s27 = smov %s3053_s28 }
 0x59a   : > { %s3824_s28 = smov %s3057_s29  ;;  %s3825_s29 = smov %s3151_s14 }
 0x59b   : > { %s3826_s30 = smov %s3140_s11  ;;  %20 = sbr.rel (!%p18_p2) target bundleno = 3 (0x3), region = 87 }
 0x5a0   :  { %2321 = vsyncpa [#allocation3], 1 }
 0x5a1   :  { %2323 = vsyncpa [#allocation3 + $0x1], 1 }

</bundles_post_ra>
